<compile_context>
chip_gen: v7x
topology: tpu7x:2x2x1
jax: 0.10.0
libtpu: 0.0.40
codegen_flags: <defaults>
</compile_context>

<pallas_src>
import math

import jax
import jax.numpy as jnp
from jax.experimental import pallas as pl
from jax.experimental.pallas import tpu as pltpu


_LANE = 128
# Per-pipeline-buffer byte budget for the streamed (emb + hid) input blocks.
_INPUT_BLOCK_BUDGET = 8 * 1024 * 1024


def _graph_pointer_kernel(bias_ref, emb_ref, hid_ref, we_ref, wh_ref, ptr_ref,
                          out_ref):
    # emb_ref: (TB, 128, E), hid_ref: (TB, 128, H)
    # we_ref:  (1, 1, E),    wh_ref:  (1, 1, H)
    # ptr_ref: (TB, 128) int32, out_ref: (TB, 128) f32, bias_ref: (1,) f32 SMEM
    logit = (jnp.sum(emb_ref[...] * we_ref[...], axis=-1)      # (TB, 128)
             + jnp.sum(hid_ref[...] * wh_ref[...], axis=-1)    # (TB, 128)
             + bias_ref[0])
    p = jax.nn.sigmoid(logit)
    out_ref[...] = jnp.where(ptr_ref[...] != 0, 1.0 - p, p)


def _row_groups_per_step(E, H, r_total):
    """Number of 128-row groups processed per grid step."""
    if r_total <= 8:
        return r_total                       # block covers the whole array
    rows = max(_LANE, _INPUT_BLOCK_BUDGET // (4 * (E + H)))
    tb = max(8, ((rows // _LANE) // 8) * 8)  # multiple of 8 -> (8,128)-dense out
    r_up = ((r_total + 7) // 8) * 8
    return min(tb, r_up)


def graph_pointer_forward(embeddings, hidden_states, pointer, weight, bias):
    """embeddings [B,S,E] f32, hidden_states [B,S,H] f32, pointer [B,S] int,
    weight [E+H] f32 (row of the (1, E+H) Linear weight), bias [1] f32."""
    B, S, E = embeddings.shape
    H = hidden_states.shape[-1]
    N = B * S

    r_total = pl.cdiv(N, _LANE)
    tb = _row_groups_per_step(E, H, r_total)
    r_pad = pl.cdiv(r_total, tb) * tb
    n_pad = r_pad * _LANE
    pad = n_pad - N

    emb = embeddings.reshape(N, E).astype(jnp.float32)
    hid = hidden_states.reshape(N, H).astype(jnp.float32)
    ptr = pointer.reshape(N).astype(jnp.int32)
    if pad:
        emb = jnp.pad(emb, ((0, pad), (0, 0)))
        hid = jnp.pad(hid, ((0, pad), (0, 0)))
        ptr = jnp.pad(ptr, ((0, pad),))
    emb = emb.reshape(r_pad, _LANE, E)
    hid = hid.reshape(r_pad, _LANE, H)
    ptr = ptr.reshape(r_pad, _LANE)

    w_e = weight[:E].reshape(1, 1, E).astype(jnp.float32)
    w_h = weight[E:].reshape(1, 1, H).astype(jnp.float32)
    bias = bias.reshape(1).astype(jnp.float32)

    # Explicit VMEM limit: double-buffered input/output/pointer blocks + slack.
    block_bytes = tb * _LANE * ((E + H) * 4 + 4 + 4)
    vmem_limit = int(min(100 * 1024 * 1024,
                         max(32 * 1024 * 1024, 2 * block_bytes + (4 << 20))))

    out = pl.pallas_call(
        _graph_pointer_kernel,
        out_shape=jax.ShapeDtypeStruct((r_pad, _LANE), jnp.float32),
        grid=(r_pad // tb,),
        in_specs=[
            pl.BlockSpec(memory_space=pltpu.MemorySpace.SMEM),        # bias
            pl.BlockSpec((tb, _LANE, E), lambda i: (i, 0, 0)),        # embeddings
            pl.BlockSpec((tb, _LANE, H), lambda i: (i, 0, 0)),        # hidden
            pl.BlockSpec((1, 1, E), lambda i: (0, 0, 0)),             # w_e (resident)
            pl.BlockSpec((1, 1, H), lambda i: (0, 0, 0)),             # w_h (resident)
            pl.BlockSpec((tb, _LANE), lambda i: (i, 0)),              # pointer
        ],
        out_specs=pl.BlockSpec((tb, _LANE), lambda i: (i, 0)),
        compiler_params=pltpu.CompilerParams(
            dimension_semantics=("parallel",),
            vmem_limit_bytes=vmem_limit),
    )(bias, emb, hid, w_e, w_h, ptr)

    return out.reshape(n_pad)[:N].reshape(B, S)


def _reference(embeddings, hidden_states, pointer, weight, bias):
    x = jnp.concatenate([embeddings, hidden_states], axis=-1)
    logit = jnp.einsum("bsd,d->bs", x, weight) + bias[0]
    p = jax.nn.sigmoid(logit)
    return jnp.where(pointer != 0, 1.0 - p, p)


if __name__ == "__main__":
    B, S, E, H = 2, 8, 32, 32

    key = jax.random.PRNGKey(0)
    k_emb, k_hid, k_ptr, k_w, k_b = jax.random.split(key, 5)

    embeddings = jax.random.normal(k_emb, (B, S, E), dtype=jnp.float32)
    hidden_states = jax.random.normal(k_hid, (B, S, H), dtype=jnp.float32)
    pointer = jax.random.bernoulli(k_ptr, 0.5, (B, S)).astype(jnp.int32)

    # Deterministic PyTorch-style Linear init: U(-1/sqrt(fan_in), 1/sqrt(fan_in))
    fan_in = E + H
    bound = 1.0 / math.sqrt(fan_in)
    weight = jax.random.uniform(k_w, (fan_in,), jnp.float32, -bound, bound)
    bias = jax.random.uniform(k_b, (1,), jnp.float32, -bound, bound)

    out = graph_pointer_forward(embeddings, hidden_states, pointer, weight, bias)
    out = jax.block_until_ready(out)

    ref = _reference(embeddings, hidden_states, pointer, weight, bias)
    if not jnp.allclose(out, ref, rtol=1e-5, atol=1e-5):
        raise AssertionError("Pallas kernel output mismatch vs JAX reference")

    print("KERNEL_OK")
</pallas_src>

<mosaic_0001>
module attributes {stable_mosaic.version = 11 : i64} {
  func.func @_graph_pointer_kernel(%arg0: i32, %arg1: memref<1xf32, #tpu.memory_space<smem>>, %arg2: memref<1x128x32xf32, #tpu.memory_space<vmem>>, %arg3: memref<1x128x32xf32, #tpu.memory_space<vmem>>, %arg4: memref<1x1x32xf32, #tpu.memory_space<vmem>>, %arg5: memref<1x1x32xf32, #tpu.memory_space<vmem>>, %arg6: memref<1x128xi32, #tpu.memory_space<vmem>>, %arg7: memref<1x128xf32, #tpu.memory_space<vmem>>) attributes {dimension_semantics = [#tpu.dimension_semantics<parallel>], iteration_bounds = array<i64: 1>, scalar_prefetch = 0 : i64, scratch_operands = 0 : i64, tpu.core_type = #tpu.core_type<tc>, window_params = [{transform_indices = @transform_0, window_bounds = array<i64: 1>}, {transform_indices = @transform_1, window_bounds = array<i64: 1, 128, 32>}, {transform_indices = @transform_2, window_bounds = array<i64: 1, 128, 32>}, {pipeline_mode = #tpu.pipeline_mode<synchronous>, transform_indices = @transform_3, window_bounds = array<i64: 1, 1, 32>}, {pipeline_mode = #tpu.pipeline_mode<synchronous>, transform_indices = @transform_4, window_bounds = array<i64: 1, 1, 32>}, {transform_indices = @transform_5, window_bounds = array<i64: 1, 128>}, {transform_indices = @transform_6, window_bounds = array<i64: 1, 128>}]} {
    %c0 = arith.constant 0 : index
    %c0_0 = arith.constant 0 : index
    %c0_1 = arith.constant 0 : index
    %0 = vector.load %arg2[%c0, %c0_0, %c0_1] : memref<1x128x32xf32, #tpu.memory_space<vmem>>, vector<1x128x32xf32>
    %c0_2 = arith.constant 0 : index
    %c0_3 = arith.constant 0 : index
    %c0_4 = arith.constant 0 : index
    %1 = vector.load %arg4[%c0_2, %c0_3, %c0_4] : memref<1x1x32xf32, #tpu.memory_space<vmem>>, vector<1x1x32xf32>
    %2 = vector.broadcast %1 : vector<1x1x32xf32> to vector<1x128x32xf32>
    %3 = arith.mulf %0, %2 : vector<1x128x32xf32>
    %cst = arith.constant dense<0.000000e+00> : vector<1x128xf32>
    %4 = vector.multi_reduction <add>, %3, %cst [2] : vector<1x128x32xf32> to vector<1x128xf32>
    %c0_5 = arith.constant 0 : index
    %c0_6 = arith.constant 0 : index
    %c0_7 = arith.constant 0 : index
    %5 = vector.load %arg3[%c0_5, %c0_6, %c0_7] : memref<1x128x32xf32, #tpu.memory_space<vmem>>, vector<1x128x32xf32>
    %c0_8 = arith.constant 0 : index
    %c0_9 = arith.constant 0 : index
    %c0_10 = arith.constant 0 : index
    %6 = vector.load %arg5[%c0_8, %c0_9, %c0_10] : memref<1x1x32xf32, #tpu.memory_space<vmem>>, vector<1x1x32xf32>
    %7 = vector.broadcast %6 : vector<1x1x32xf32> to vector<1x128x32xf32>
    %8 = arith.mulf %5, %7 : vector<1x128x32xf32>
    %cst_11 = arith.constant dense<0.000000e+00> : vector<1x128xf32>
    %9 = vector.multi_reduction <add>, %8, %cst_11 [2] : vector<1x128x32xf32> to vector<1x128xf32>
    %10 = arith.addf %4, %9 : vector<1x128xf32>
    %c0_12 = arith.constant 0 : index
    %11 = memref.load %arg1[%c0_12] : memref<1xf32, #tpu.memory_space<smem>>
    %12 = vector.broadcast %11 : f32 to vector<1x128xf32>
    %13 = arith.addf %10, %12 : vector<1x128xf32>
    %14 = arith.negf %13 : vector<1x128xf32>
    %15 = math.exp %14 : vector<1x128xf32>
    %cst_13 = arith.constant 1.000000e+00 : f32
    %16 = vector.broadcast %cst_13 : f32 to vector<1x128xf32>
    %17 = arith.addf %16, %15 : vector<1x128xf32>
    %18 = arith.divf %16, %17 : vector<1x128xf32>
    %c0_14 = arith.constant 0 : index
    %c0_15 = arith.constant 0 : index
    %19 = vector.load %arg6[%c0_14, %c0_15] : memref<1x128xi32, #tpu.memory_space<vmem>>, vector<1x128xi32>
    %c0_i32 = arith.constant 0 : i32
    %20 = vector.broadcast %c0_i32 : i32 to vector<1x128xi32>
    %21 = arith.cmpi ne, %19, %20 : vector<1x128xi32>
    %cst_16 = arith.constant 1.000000e+00 : f32
    %22 = vector.broadcast %cst_16 : f32 to vector<1x128xf32>
    %23 = arith.subf %22, %18 : vector<1x128xf32>
    %24 = arith.select %21, %23, %18 : vector<1x128xi1>, vector<1x128xf32>
    %c0_17 = arith.constant 0 : index
    %c0_18 = arith.constant 0 : index
    %25 = vector.load %arg7[%c0_17, %c0_18] : memref<1x128xf32, #tpu.memory_space<vmem>>, vector<1x128xf32>
    tpu.vector_store %arg7[%c0_17, %c0_18], %24 {strides = array<i32>} : memref<1x128xf32, #tpu.memory_space<vmem>>, vector<1x128xf32>,
    return
  }
  func.func @transform_0(%arg0: i32) -> i32 {
    %c0_i32 = arith.constant 0 : i32
    %c0_i32_0 = arith.constant 0 : i32
    return %c0_i32 : i32
  }
  func.func @transform_1(%arg0: i32) -> (i32, i32, i32) {
    %c0_i32 = arith.constant 0 : i32
    %c0_i32_0 = arith.constant 0 : i32
    %c0_i32_1 = arith.constant 0 : i32
    return %arg0, %c0_i32, %c0_i32_0 : i32, i32, i32
  }
  func.func @transform_2(%arg0: i32) -> (i32, i32, i32) {
    %c0_i32 = arith.constant 0 : i32
    %c0_i32_0 = arith.constant 0 : i32
    %c0_i32_1 = arith.constant 0 : i32
    return %arg0, %c0_i32, %c0_i32_0 : i32, i32, i32
  }
  func.func @transform_3(%arg0: i32) -> (i32, i32, i32) {
    %c0_i32 = arith.constant 0 : i32
    %c0_i32_0 = arith.constant 0 : i32
    %c0_i32_1 = arith.constant 0 : i32
    %c0_i32_2 = arith.constant 0 : i32
    return %c0_i32, %c0_i32_0, %c0_i32_1 : i32, i32, i32
  }
  func.func @transform_4(%arg0: i32) -> (i32, i32, i32) {
    %c0_i32 = arith.constant 0 : i32
    %c0_i32_0 = arith.constant 0 : i32
    %c0_i32_1 = arith.constant 0 : i32
    %c0_i32_2 = arith.constant 0 : i32
    return %c0_i32, %c0_i32_0, %c0_i32_1 : i32, i32, i32
  }
  func.func @transform_5(%arg0: i32) -> (i32, i32) {
    %c0_i32 = arith.constant 0 : i32
    %c0_i32_0 = arith.constant 0 : i32
    return %arg0, %c0_i32 : i32, i32
  }
  func.func @transform_6(%arg0: i32) -> (i32, i32) {
    %c0_i32 = arith.constant 0 : i32
    %c0_i32_0 = arith.constant 0 : i32
    return %arg0, %c0_i32 : i32, i32
  }
}

</mosaic_0001>

<bundles_post_ra>
// kernel: tpu_custom_call.1
= control target key start
LH: loop header
LB: loop body
LE: loop exit
PB: predicated region body
PF: predicated region fallthrough
CT: control target
= control target key end

     0   :  { %vm64_vm0 = vcmask 261120   ;;  %s4441_s0 = inlined_call_operand.<no memory space> [shape: f32[1], index: 0, kind: input, shape index: {}]   ;;  %s4442_s1 = inlined_call_operand.vmem [shape: f32[1,128,32], index: 1, kind: input, shape index: {}]   ;;  %s4443_s2 = inlined_call_operand.vmem [shape: f32[1,128,32], index: 2, kind: input, shape index: {}]   ;;  %s4444_s3 = inlined_call_operand.vmem [shape: f32[1,1,32], index: 3, kind: input, shape index: {}]   ;;  %s4445_s4 = inlined_call_operand.vmem [shape: f32[1,1,32], index: 4, kind: input, shape index: {}]   ;;  %s4446_s5 = inlined_call_operand.vmem [shape: s32[1,128], index: 5, kind: input, shape index: {}]   ;;  %s4447_s6 = inlined_call_operand.hbm [shape: f32[1,128], index: 6, kind: output, shape index: {}]  }
   0x1   :  { %v27_v0 = vld [vmem:[%s4442_s1 + $0x10] sm:$0xff]  ;;  %v3459_v1 = vld [vmem:[%s4444_s3] ss:$0 sm:$0xff]  ;;  %v26_v7 = vld [vmem:[%s4442_s1 + $0x8] sm:$0xff] }
   0x2   :  { %v25_v2 = vld [vmem:[%s4442_s1] sm:$0xff]  ;;  %v50_v3 = vmul.f32 %v3459_v1, %v27_v0  ;;  %v49_v9 = vmul.f32 %v3459_v1, %v26_v7  ;;  %v115_v10 = vld [vmem:[%s4443_s2 + $0x10] sm:$0xff]  ;;  %v114_v11 = vld [vmem:[%s4443_s2 + $0x8] sm:$0xff] }
   0x3   :  { %v48_v4 = vmul.f32 %v3459_v1, %v25_v2  ;;  %v113_v5 = vld [vmem:[%s4443_s2] sm:$0xff]  ;;  %v116_v18 = vld [vmem:[%s4443_s2 + $0x18] sm:$0xff] }
   0x4   :  { %v3472_v6 = vld [vmem:[%s4445_s4] ss:$0 sm:$0xff]  ;;  %v71_v12 = vsel %vm64_vm0, %v50_v3, 0.0  ;;  %v68_v15 = vsel %vm64_vm0, %v49_v9, 0.0  ;;  %v28_v19 = vld [vmem:[%s4442_s1 + $0x18] sm:$0xff] }
   0x5   :  { %v136_v8 = vmul.f32 %v3472_v6, %v113_v5  ;;  %v65_v13 = vsel %vm64_vm0, %v48_v4, 0.0  ;;  %72 = vadd.xlane.f32.xlu1 %v71_v12  ;;  %v138_v16 = vmul.f32 %v3472_v6, %v115_v10  ;;  %v137_v17 = vmul.f32 %v3472_v6, %v114_v11  ;;  %v117_v24 = vld [vmem:[%s4443_s2 + $0x20] sm:$0xff] }
   0x6   :  { %66 = vadd.xlane.f32.xlu0 %v65_v13  ;;  %v139_v22 = vmul.f32 %v3472_v6, %v116_v18  ;;  %v51_v23 = vmul.f32 %v3459_v1, %v28_v19  ;;  %v29_v25 = vld [vmem:[%s4442_s1 + $0x20] sm:$0xff] }
   0x7   :  { %v152_v14 = vsel %vm64_vm0, %v136_v8, 0.0  ;;  %v158_v20 = vsel %vm64_vm0, %v138_v16, 0.0  ;;  %v155_v21 = vsel %vm64_vm0, %v137_v17, 0.0 }
   0x9   :  { %153 = vadd.xlane.f32.xlu1 %v152_v14 }
   0xa   :  { %69 = vadd.xlane.f32.xlu0 %v68_v15 }
   0xb   :  { %12 = vsyncpa [#allocation4], 0  ;;  %v161_v26 = vsel %vm64_vm0, %v139_v22, 0.0  ;;  %v74_v27 = vsel %vm64_vm0, %v51_v23, 0.0  ;;  %v140_v28 = vmul.f32 %v3472_v6, %v117_v24  ;;  %v52_v29 = vmul.f32 %v3459_v1, %v29_v25  ;;  %v118_v30 = vld [vmem:[%s4443_s2 + $0x28] sm:$0xff]  ;;  %v119_v36 = vld [vmem:[%s4443_s2 + $0x30] sm:$0xff] }
   0xc   :  { %v30_v31 = vld [vmem:[%s4442_s1 + $0x28] sm:$0xff]  ;;  %v141_v34 = vmul.f32 %v3472_v6, %v118_v30  ;;  %v31_v37 = vld [vmem:[%s4442_s1 + $0x30] sm:$0xff]  ;;  %v142_v40 = vmul.f32 %v3472_v6, %v119_v36  ;;  %v120_v42 = vld [vmem:[%s4443_s2 + $0x38] sm:$0xff]  ;;  %v3415_v36 = vmov 0   ;;  %vm1719_vm1 = vcmask 130112   ;;  %s3417_s12 = smov [#allocation3]  }
   0xd   :  { %159 = vadd.xlane.f32.xlu1 %v158_v20  ;;  %v164_v32 = vsel %vm64_vm0, %v140_v28, 0.0  ;;  %v77_v33 = vsel %vm64_vm0, %v52_v29, 0.0  ;;  %v53_v35 = vmul.f32 %v3459_v1, %v30_v31  ;;  %v54_v41 = vmul.f32 %v3459_v1, %v31_v37  ;;  %v32_v43 = vld [vmem:[%s4442_s1 + $0x38] sm:$0xff]  ;;  %v121_v48 = vld [vmem:[%s4443_s2 + $0x40] sm:$0xff]  ;;  %v122_v54 = vld [vmem:[%s4443_s2 + $0x48] sm:$0xff]  ;;  %3326 = vset.pattern.permute.xlu0 %v3415_v36  ;;  %s3296_s13 = sshll.u32 %s3417_s12, 4  ;;  %s3297_s13 = int_to_ptr.vmem [resolvable:$true] %s3296_s13 }
   0xe   :  { %156 = vadd.xlane.f32.xlu0 %v155_v21  ;;  %v167_v38 = vsel %vm64_vm0, %v141_v34, 0.0  ;;  %v170_v44 = vsel %vm64_vm0, %v142_v40, 0.0  ;;  %v143_v46 = vmul.f32 %v3472_v6, %v120_v42  ;;  %v55_v47 = vmul.f32 %v3459_v1, %v32_v43  ;;  %v33_v49 = vld [vmem:[%s4442_s1 + $0x40] sm:$0xff]  ;;  %v34_v55 = vld [vmem:[%s4442_s1 + $0x48] sm:$0xff]  ;;  %v123_v60 = vld [vmem:[%s4443_s2 + $0x50] sm:$0xff]  ;;  %3325 = vset.pattern.permute.xlu1 %v3415_v36  ;;  %s3391_s14 = scalar_lea.vmem %s3297_s13, 16  ;;  %p3396_p1 = scmp.lt.s32.totalorder %s3297_s13, %s3297_s13 }
   0xf   :  { %v80_v39 = vsel %vm64_vm0, %v53_v35, 0.0  ;;  %v83_v45 = vsel %vm64_vm0, %v54_v41, 0.0  ;;  %v144_v52 = vmul.f32 %v3472_v6, %v121_v48  ;;  %v56_v53 = vmul.f32 %v3459_v1, %v33_v49  ;;  %v35_v61 = vld [vmem:[%s4442_s1 + $0x50] sm:$0xff]  ;;  %v124_v3 = vld [vmem:[%s4443_s2 + $0x58] sm:$0xff]  ;;  %v125_v10 = vld [vmem:[%s4443_s2 + $0x60] sm:$0xff]  ;;  %p3392_p0 = scmp.ne.s32.totalorder %s3297_s13, %s3391_s14  ;;  %s3395_s15 = scalar_lea.vmem %s3297_s13, 32 }
  0x10   :  { %v173_v50 = vsel %vm64_vm0, %v143_v46, 0.0  ;;  %v86_v51 = vsel %vm64_vm0, %v55_v47, 0.0  ;;  %v145_v58 = vmul.f32 %v3472_v6, %v122_v54  ;;  %v57_v59 = vmul.f32 %v3459_v1, %v34_v55  ;;  %v36_v4 = vld [vmem:[%s4442_s1 + $0x58] sm:$0xff]  ;;  %v37_v11 = vld [vmem:[%s4442_s1 + $0x60] sm:$0xff]  ;;  %v126_v16 = vld [vmem:[%s4443_s2 + $0x68] sm:$0xff]  ;;  %p3397_p2 = scmp.lt.s32.totalorder %s3395_s15, %s3391_s14 }
  0x11   :  { %162 = vadd.xlane.f32.xlu1 %v161_v26  ;;  %v176_v56 = vsel %vm64_vm0, %v144_v52, 0.0  ;;  %v89_v57 = vsel %vm64_vm0, %v56_v53, 0.0  ;;  %v146_v0 = vmul.f32 %v3472_v6, %v123_v60  ;;  %v58_v2 = vmul.f32 %v3459_v1, %v35_v61  ;;  %v38_v17 = vld [vmem:[%s4442_s1 + $0x68] sm:$0xff]  ;;  %v127_v22 = vld [vmem:[%s4443_s2 + $0x70] sm:$0xff]  ;;  %v128_v28 = vld [vmem:[%s4443_s2 + $0x78] sm:$0xff] }
  0x12   :  { %75 = vadd.xlane.f32.xlu0 %v74_v27  ;;  %v179_v62 = vsel %vm64_vm0, %v145_v58, 0.0  ;;  %v92_v63 = vsel %vm64_vm0, %v57_v59, 0.0  ;;  %v147_v8 = vmul.f32 %v3472_v6, %v124_v3  ;;  %v59_v9 = vmul.f32 %v3459_v1, %v36_v4  ;;  %v39_v23 = vld [vmem:[%s4442_s1 + $0x70] sm:$0xff]  ;;  %v40_v29 = vld [vmem:[%s4442_s1 + $0x78] sm:$0xff]  ;;  %p3398_p3 = por %p3397_p2, %p3396_p1 }
  0x13   :  { %v182_v5 = vsel %vm64_vm0, %v146_v0, 0.0  ;;  %v95_v7 = vsel %vm64_vm0, %v58_v2, 0.0  ;;  %v148_v14 = vmul.f32 %v3472_v6, %v125_v10  ;;  %v60_v15 = vmul.f32 %v3459_v1, %v37_v11 }
  0x14   :  { %v185_v12 = vsel %vm64_vm0, %v147_v8, 0.0  ;;  %v98_v13 = vsel %vm64_vm0, %v59_v9, 0.0  ;;  %v149_v20 = vmul.f32 %v3472_v6, %v126_v16  ;;  %v61_v21 = vmul.f32 %v3459_v1, %v38_v17  ;;  %p3399_p4 = pnand %p3398_p3, %p3392_p0 }
  0x15   :  { %165 = vadd.xlane.f32.xlu1 %v164_v32  ;;  %v188_v18 = vsel %vm64_vm0, %v148_v14, 0.0  ;;  %v101_v19 = vsel %vm64_vm0, %v60_v15, 0.0  ;;  %v150_v26 = vmul.f32 %v3472_v6, %v127_v22  ;;  %v62_v27 = vmul.f32 %v3459_v1, %v39_v23 }
  0x16   :  { %78 = vadd.xlane.f32.xlu0 %v77_v33  ;;  %v191_v24 = vsel %vm64_vm0, %v149_v20, 0.0  ;;  %v104_v25 = vsel %vm64_vm0, %v61_v21, 0.0  ;;  %v151_v32 = vmul.f32 %v3472_v6, %v128_v28  ;;  %v63_v33 = vmul.f32 %v3459_v1, %v40_v29 }
  0x17   :  { %v194_v30 = vsel %vm64_vm0, %v150_v26, 0.0  ;;  %v107_v31 = vsel %vm64_vm0, %v62_v27, 0.0  ;;  %v364_v4 = vlaneseq  ;;  %vm1726_vm2 = vcmask 195712  }
  0x18   :  { %v197_v34 = vsel %vm64_vm0, %v151_v32, 0.0  ;;  %v110_v35 = vsel %vm64_vm0, %v63_v33, 0.0  ;;  %vm1733_vm3 = vcmask 261312   ;;  %vm1740_vm4 = vcmask 326912  }
  0x19   :  { %168 = vadd.xlane.f32.xlu1 %v167_v38  ;;  %v3636_v16 = vshrl.u32 %v364_v4, 7  ;;  %vm1747_vm5 = vcmask 392512   ;;  %vm1754_vm6 = vcmask 458112   ;;  %vm1761_vm7 = vcmask 523712  }
  0x1a   :  { %81 = vadd.xlane.f32.xlu0 %v80_v39  ;;  %v3626_v39 = vstv %s4441_s0  ;;  %vm1768_vm8 = vcmask 589312   ;;  %vm1775_vm9 = vcmask 654912   ;;  %vm1782_vm10 = vcmask 720512  }
  0x1b   :  { %v3640_v26 = vsub.s32 0, %v3636_v16  ;;  %v3643_v27 = vsub.s32 1, %v3636_v16  ;;  %v3652_v32 = vsub.s32 4, %v3636_v16  ;;  %v3655_v33 = vsub.s32 5, %v3636_v16 }
  0x1c   :  { %vm1789_vm11 = vcmask 786112   ;;  %vm1796_vm12 = vcmask 851712   ;;  %vm1803_vm13 = vcmask 917312   ;;  %vm1810_vm14 = vcmask 982912  }
  0x1d   :  { %171 = vadd.xlane.f32.xlu1 %v170_v44  ;;  %vm1817_vm15 = vcmask 1048512  }
  0x1e   :  { %84 = vadd.xlane.f32.xlu0 %v83_v45 }
  0x21   :  { %174 = vadd.xlane.f32.xlu1 %v173_v50 }
  0x22   :  { %87 = vadd.xlane.f32.xlu0 %v86_v51 }
  0x25   :  { %177 = vadd.xlane.f32.xlu1 %v176_v56 }
  0x26   :  { %90 = vadd.xlane.f32.xlu0 %v89_v57 }
  0x29   :  { %180 = vadd.xlane.f32.xlu1 %v179_v62 }
  0x2a   :  { %93 = vadd.xlane.f32.xlu0 %v92_v63 }
  0x2d   :  { %183 = vadd.xlane.f32.xlu1 %v182_v5 }
  0x2e   :  { %96 = vadd.xlane.f32.xlu0 %v95_v7 }
  0x31   :  { %186 = vadd.xlane.f32.xlu1 %v185_v12 }
  0x32   :  { %99 = vadd.xlane.f32.xlu0 %v98_v13  ;;  %v3416_v13 = vmov 1966171168  }
  0x33   :  { %v881_v14 = vunpack.c.l.s4 %v3416_v13 }
  0x35   :  { %189 = vadd.xlane.f32.xlu1 %v188_v18 }
  0x36   :  { %102 = vadd.xlane.f32.xlu0 %v101_v19 }
  0x39   :  { %192 = vadd.xlane.f32.xlu1 %v191_v24  ;;  %v882_v24 = vunpack.c.0.s8 %v881_v14 }
  0x3a   :  { %105 = vadd.xlane.f32.xlu0 %v104_v25 }
  0x3d   :  { %195 = vadd.xlane.f32.xlu1 %v194_v30  ;;  %v3646_v30 = vsub.s32 2, %v3636_v16 }
  0x3e   :  { %108 = vadd.xlane.f32.xlu0 %v107_v31  ;;  %v3649_v31 = vsub.s32 3, %v3636_v16 }
  0x41   :  { %198 = vadd.xlane.f32.xlu1 %v197_v34 }
  0x42   :  { %111 = vadd.xlane.f32.xlu0 %v110_v35 }
  0x92   :  { %v73_v37 = vpop.xlane.xlu1 %72 }
  0x93   :  { %v67_v38 = vpop.xlane.xlu0 %66 }
  0x96   :  { %v154_v6 = vpop.xlane.xlu1 %153 }
  0x97   :  { %v70_v1 = vpop.xlane.xlu0 %69  ;;  %v200_v40 = vadd.f32 %v154_v6, %v67_v38 }
  0x99   :  { %v218_v41 = vadd.f32 %v3626_v39, %v200_v40  ;;  %v3666_v40 = vsub.s32 %v882_v24, %v3636_v16 }
  0x9a   :  { %v160_v42 = vpop.xlane.xlu1 %159 }
  0x9b   :  { %v157_v43 = vpop.xlane.xlu0 %156  ;;  %v3306_v44 = vmul.f32 -1.442695, %v218_v41  ;;  %v202_v45 = vadd.f32 %v160_v42, %v73_v37  ;;  %v3658_v37 = vsub.s32 6, %v3636_v16 }
  0x9c   :  { %v201_v46 = vadd.f32 %v157_v43, %v70_v1  ;;  %v3663_v1 = vsub.s32 7, %v3636_v16 }
  0x9d   :  { %3327 = vpow2.f32 %v3306_v44  ;;  %v220_v47 = vadd.f32 %v3626_v39, %v202_v45 }
  0x9e   :  { %v219_v48 = vadd.f32 %v3626_v39, %v201_v46  ;;  %v163_v49 = vpop.xlane.xlu1 %162 }
  0x9f   :  { %v76_v50 = vpop.xlane.xlu0 %75  ;;  %v3308_v51 = vmul.f32 -1.442695, %v220_v47 }
  0xa0   :  { %v3307_v52 = vmul.f32 -1.442695, %v219_v48  ;;  %v203_v53 = vadd.f32 %v163_v49, %v76_v50 }
  0xa1   :  { %3329 = vpow2.f32 %v3308_v51 }
  0xa2   :  { %v221_v54 = vadd.f32 %v3626_v39, %v203_v53  ;;  %3331 = vpow2.f32 %v3307_v52  ;;  %v166_v55 = vpop.xlane.xlu1 %165 }
  0xa3   :  { %v79_v56 = vpop.xlane.xlu0 %78 }
  0xa4   :  { %v3309_v57 = vmul.f32 -1.442695, %v221_v54  ;;  %v204_v58 = vadd.f32 %v166_v55, %v79_v56 }
  0xa6   :  { %3333 = vpow2.f32 %v3309_v57  ;;  %v222_v59 = vadd.f32 %v3626_v39, %v204_v58  ;;  %v169_v60 = vpop.xlane.xlu1 %168 }
  0xa7   :  { %v82_v61 = vpop.xlane.xlu0 %81  ;;  %v3328_v62 = vpop.eup %3327 }
  0xa8   :  { %v3310_v63 = vmul.f32 -1.442695, %v222_v59  ;;  %v205_v0 = vadd.f32 %v169_v60, %v82_v61  ;;  %v282_v2 = vadd.f32 1.0, %v3328_v62 }
  0xaa   :  { %3335 = vpow2.f32 %v3310_v63  ;;  %v223_v3 = vadd.f32 %v3626_v39, %v205_v0  ;;  %v172_v5 = vpop.xlane.xlu1 %171 }
  0xab   :  { %3337 = vrcp.f32 %v282_v2  ;;  %v85_v7 = vpop.xlane.xlu0 %84  ;;  %v3330_v8 = vpop.eup %3329 }
  0xac   :  { %v3311_v9 = vmul.f32 -1.442695, %v223_v3  ;;  %v206_v10 = vadd.f32 %v172_v5, %v85_v7  ;;  %v3332_v11 = vpop.eup %3331  ;;  %v284_v12 = vadd.f32 1.0, %v3330_v8 }
  0xad   :  { %v283_v20 = vadd.f32 1.0, %v3332_v11 }
  0xae   :  { %3339 = vpow2.f32 %v3311_v9  ;;  %v224_v15 = vadd.f32 %v3626_v39, %v206_v10  ;;  %v175_v17 = vpop.xlane.xlu1 %174 }
  0xaf   :  { %3341 = vrcp.f32 %v284_v12  ;;  %v88_v18 = vpop.xlane.xlu0 %87 }
  0xb0   :  { %v3334_v19 = vpop.eup %3333  ;;  %v3312_v21 = vmul.f32 -1.442695, %v224_v15  ;;  %v207_v22 = vadd.f32 %v175_v17, %v88_v18 }
  0xb1   :  { %v285_v23 = vadd.f32 1.0, %v3334_v19 }
  0xb2   :  { %3343 = vpow2.f32 %v3312_v21  ;;  %v225_v25 = vadd.f32 %v3626_v39, %v207_v22  ;;  %v178_v28 = vpop.xlane.xlu1 %177 }
  0xb3   :  { %v91_v29 = vpop.xlane.xlu0 %90  ;;  %3345 = vrcp.f32 %v283_v20 }
  0xb4   :  { %v3336_v34 = vpop.eup %3335  ;;  %v3313_v35 = vmul.f32 -1.442695, %v225_v25  ;;  %v208_v36 = vadd.f32 %v178_v28, %v91_v29  ;;  %3347 = vrcp.f32 %v285_v23 }
  0xb5   :  { %v3660_v38 = vpop.eup %3337  ;;  %v286_v6 = vadd.f32 1.0, %v3336_v34 }
  0xb6   :  { %3349 = vpow2.f32 %v3313_v35  ;;  %v226_v41 = vadd.f32 %v3626_v39, %v208_v36  ;;  %v1853_v42 = vrot.slane %v3660_v38, %v3640_v26  ;;  %v1857_v43 = vrot.slane %v3660_v38, %v3643_v27  ;;  %v181_v44 = vpop.xlane.xlu1 %180 }
  0xb7   :  { %3351 = vrcp.f32 %v286_v6  ;;  %v94_v45 = vpop.xlane.xlu0 %93  ;;  %v1861_v46 = vrot.slane %v3660_v38, %v3646_v30  ;;  %v1865_v47 = vrot.slane %v3660_v38, %v3649_v31  ;;  %v1869_v48 = vrot.slane %v3660_v38, %v3652_v32 }
  0xb8   :  { %v3340_v49 = vpop.eup %3339  ;;  %v3314_v50 = vmul.f32 -1.442695, %v226_v41  ;;  %v209_v51 = vadd.f32 %v181_v44, %v94_v45  ;;  %v1873_v52 = vrot.slane %v3660_v38, %v3655_v33  ;;  %v1877_v53 = vrot.slane %v3660_v38, %v3658_v37 }
  0xb9   :  { %v3683_v54 = vpop.eup %3341  ;;  %v287_v55 = vadd.f32 1.0, %v3340_v49  ;;  %v1881_v56 = vrot.slane %v3660_v38, %v3663_v1  ;;  %v2362_v57 = vcombine.low %v1853_v42, %v1857_v43  ;;  %v2363_v58 = vcombine.low %v1861_v46, %v1865_v47 }
  0xba   :  { %3353 = vpow2.f32 %v3314_v50  ;;  %v227_v59 = vadd.f32 %v3626_v39, %v209_v51  ;;  %v2364_v60 = vcombine.low %v1869_v48, %v1873_v52  ;;  %v1917_v61 = vrot.slane %v3683_v54, %v3640_v26  ;;  %v184_v62 = vpop.xlane.xlu1 %183 }
  0xbb   :  { %3355 = vrcp.f32 %v287_v55  ;;  %v97_v63 = vpop.xlane.xlu0 %96  ;;  %v2365_v0 = vcombine.low %v1877_v53, %v1881_v56  ;;  %v2372_v2 = vrot.slane %v2362_v57, %v3666_v40  ;;  %v2379_v3 = vrot.slane %v2363_v58, %v3666_v40 }
  0xbc   :  { %v3344_v5 = vpop.eup %3343  ;;  %v3315_v7 = vmul.f32 -1.442695, %v227_v59  ;;  %v210_v8 = vadd.f32 %v184_v62, %v97_v63  ;;  %v2386_v9 = vrot.slane %v2364_v60, %v3666_v40  ;;  %v1921_v10 = vrot.slane %v3683_v54, %v3643_v27 }
  0xbd   :  { %v288_v11 = vadd.f32 1.0, %v3344_v5  ;;  %v2393_v12 = vrot.slane %v2365_v0, %v3666_v40  ;;  %v2394_v13 = vcombine.low %v2372_v2, %v2379_v3  ;;  %v1925_v14 = vrot.slane %v3683_v54, %v3646_v30  ;;  %v3698_v15 = vpop.eup %3345 }
  0xbe   :  { %3357 = vpow2.f32 %v3315_v7  ;;  %v228_v17 = vadd.f32 %v3626_v39, %v210_v8  ;;  %v1929_v18 = vrot.slane %v3683_v54, %v3649_v31  ;;  %v1933_v19 = vrot.slane %v3683_v54, %v3652_v32  ;;  %v3705_v20 = vpop.eup %3347  ;;  %v187_v21 = vpop.xlane.xlu1 %186 }
  0xbf   :  { %3359 = vrcp.f32 %v288_v11  ;;  %v100_v22 = vpop.xlane.xlu0 %99  ;;  %v2395_v23 = vcombine.low %v2386_v9, %v2393_v12  ;;  %v2402_v24 = vrot.slane %v2394_v13, %v3666_v40  ;;  %v1937_v25 = vrot.slane %v3683_v54, %v3655_v33 }
  0xc0   :  { %v3350_v28 = vpop.eup %3349  ;;  %v3316_v29 = vmul.f32 -1.442695, %v228_v17  ;;  %v211_v34 = vadd.f32 %v187_v21, %v100_v22  ;;  %v1941_v35 = vrot.slane %v3683_v54, %v3658_v37  ;;  %v1945_v36 = vrot.slane %v3683_v54, %v3663_v1 }
  0xc1   :  { %v3714_v6 = vpop.eup %3351  ;;  %v289_v41 = vadd.f32 1.0, %v3350_v28  ;;  %v2409_v42 = vrot.slane %v2395_v23, %v3666_v40  ;;  %v2460_v43 = vcombine.low %v1917_v61, %v1921_v10  ;;  %v2461_v44 = vcombine.low %v1925_v14, %v1929_v18 }
  0xc2   :  { %3361 = vpow2.f32 %v3316_v29  ;;  %v229_v45 = vadd.f32 %v3626_v39, %v211_v34  ;;  %v2462_v46 = vcombine.low %v1933_v19, %v1937_v25  ;;  %v2463_v47 = vcombine.low %v1941_v35, %v1945_v36  ;;  %v190_v49 = vpop.xlane.xlu1 %189 }
  0xc3   :  { %3363 = vrcp.f32 %v289_v41  ;;  %v2410_v48 = vcombine.low %v2402_v24, %v2409_v42  ;;  %v103_v50 = vpop.xlane.xlu0 %102  ;;  %v2470_v51 = vrot.slane %v2460_v43, %v3666_v40  ;;  %v2477_v52 = vrot.slane %v2461_v44, %v3666_v40 }
  0xc4   :  { %v3354_v53 = vpop.eup %3353  ;;  %v3317_v55 = vmul.f32 -1.442695, %v229_v45  ;;  %v212_v56 = vadd.f32 %v190_v49, %v103_v50  ;;  %v2484_v57 = vrot.slane %v2462_v46, %v3666_v40  ;;  %v2491_v58 = vrot.slane %v2463_v47, %v3666_v40 }
  0xc5   :  { %v3722_v59 = vpop.eup %3355  ;;  %v290_v60 = vadd.f32 1.0, %v3354_v53  ;;  %3147 = vperm.xlu1 %3325, %v2410_v48   ;;  %v2492_v61 = vcombine.low %v2470_v51, %v2477_v52  ;;  %v1885_v62 = vrot.slane %v3698_v15, %v3640_v26  ;;  %v1889_v63 = vrot.slane %v3698_v15, %v3643_v27 }
  0xc6   :  { %3365 = vpow2.f32 %v3317_v55  ;;  %v230_v0 = vadd.f32 %v3626_v39, %v212_v56  ;;  %v2493_v2 = vcombine.low %v2484_v57, %v2491_v58  ;;  %v1893_v3 = vrot.slane %v3698_v15, %v3646_v30  ;;  %v193_v48 = vpop.xlane.xlu1 %192 }
  0xc7   :  { %3367 = vrcp.f32 %v290_v60  ;;  %v2500_v5 = vrot.slane %v2492_v61, %v3666_v40  ;;  %v1897_v7 = vrot.slane %v3698_v15, %v3649_v31  ;;  %v1901_v8 = vrot.slane %v3698_v15, %v3652_v32  ;;  %v106_v49 = vpop.xlane.xlu0 %105 }
  0xc8   :  { %v3358_v9 = vpop.eup %3357  ;;  %v3318_v10 = vmul.f32 -1.442695, %v230_v0  ;;  %v2507_v11 = vrot.slane %v2493_v2, %v3666_v40  ;;  %v1905_v12 = vrot.slane %v3698_v15, %v3655_v33  ;;  %v1909_v13 = vrot.slane %v3698_v15, %v3658_v37 }
  0xc9   :  { %v3741_v14 = vpop.eup %3359  ;;  %v291_v17 = vadd.f32 1.0, %v3358_v9  ;;  %v1913_v18 = vrot.slane %v3698_v15, %v3663_v1  ;;  %v2411_v19 = vcombine.low %v1885_v62, %v1889_v63  ;;  %v2412_v21 = vcombine.low %v1893_v3, %v1897_v7 }
  0xca   :  { %3369 = vpow2.f32 %v3318_v10  ;;  %v2508_v22 = vcombine.low %v2500_v5, %v2507_v11  ;;  %v2413_v23 = vcombine.low %v1901_v8, %v1905_v12  ;;  %v1949_v24 = vrot.slane %v3705_v20, %v3640_v26 }
  0xcb   :  { %3371 = vrcp.f32 %v291_v17  ;;  %v2414_v25 = vcombine.low %v1909_v13, %v1913_v18  ;;  %v2421_v28 = vrot.slane %v2411_v19, %v3666_v40  ;;  %v2428_v29 = vrot.slane %v2412_v21, %v3666_v40 }
  0xcc   :  { %v3362_v34 = vpop.eup %3361  ;;  %3153 = vperm.xlu1 %3325, %v2508_v22   ;;  %v2435_v35 = vrot.slane %v2413_v23, %v3666_v40  ;;  %v1953_v36 = vrot.slane %v3705_v20, %v3643_v27  ;;  %v1957_v41 = vrot.slane %v3705_v20, %v3646_v30  ;;  %v1961_v42 = vrot.slane %v3705_v20, %v3649_v31 }
  0xcd   :  { %v3756_v43 = vpop.eup %3363  ;;  %v292_v44 = vadd.f32 1.0, %v3362_v34  ;;  %v2442_v45 = vrot.slane %v2414_v25, %v3666_v40  ;;  %v2443_v46 = vcombine.low %v2421_v28, %v2428_v29  ;;  %v1965_v47 = vrot.slane %v3705_v20, %v3652_v32 }
  0xce   :  { %v1969_v50 = vrot.slane %v3705_v20, %v3655_v33  ;;  %v1973_v51 = vrot.slane %v3705_v20, %v3658_v37  ;;  %v1977_v52 = vrot.slane %v3705_v20, %v3663_v1  ;;  %v2509_v53 = vcombine.low %v1949_v24, %v1953_v36 }
  0xcf   :  { %3373 = vrcp.f32 %v292_v44  ;;  %v2444_v55 = vcombine.low %v2435_v35, %v2442_v45  ;;  %v2451_v56 = vrot.slane %v2443_v46, %v3666_v40  ;;  %v2510_v57 = vcombine.low %v1957_v41, %v1961_v42 }
  0xd0   :  { %v3366_v58 = vpop.eup %3365  ;;  %v2511_v60 = vcombine.low %v1965_v47, %v1969_v50  ;;  %v2512_v61 = vcombine.low %v1973_v51, %v1977_v52  ;;  %v2519_v62 = vrot.slane %v2509_v53, %v3666_v40  ;;  %v213_v63 = vadd.f32 %v193_v48, %v106_v49 }
  0xd1   :  { %v3769_v0 = vpop.eup %3367  ;;  %v293_v2 = vadd.f32 1.0, %v3366_v58  ;;  %v2458_v3 = vrot.slane %v2444_v55, %v3666_v40  ;;  %v2526_v5 = vrot.slane %v2510_v57, %v3666_v40  ;;  %v1981_v7 = vrot.slane %v3714_v6, %v3640_v26  ;;  %v109_v57 = vpop.xlane.xlu0 %108 }
  0xd2   :  { %v2533_v8 = vrot.slane %v2511_v60, %v3666_v40  ;;  %v2540_v9 = vrot.slane %v2512_v61, %v3666_v40  ;;  %v231_v10 = vadd.f32 %v3626_v39, %v213_v63  ;;  %v1985_v11 = vrot.slane %v3714_v6, %v3643_v27 }
  0xd3   :  { %3375 = vrcp.f32 %v293_v2  ;;  %v2459_v12 = vcombine.low %v2451_v56, %v2458_v3  ;;  %v2541_v13 = vcombine.low %v2519_v62, %v2526_v5  ;;  %v1989_v17 = vrot.slane %v3714_v6, %v3646_v30  ;;  %v196_v56 = vpop.xlane.xlu1 %195 }
  0xd4   :  { %v3370_v18 = vpop.eup %3369  ;;  %v2542_v19 = vcombine.low %v2533_v8, %v2540_v9  ;;  %v3319_v21 = vmul.f32 -1.442695, %v231_v10  ;;  %v1993_v22 = vrot.slane %v3714_v6, %v3649_v31  ;;  %v1997_v23 = vrot.slane %v3714_v6, %v3652_v32 }
  0xd5   :  { %v3786_v24 = vpop.eup %3371  ;;  %v294_v25 = vadd.f32 1.0, %v3370_v18  ;;  %3150 = vperm.xlu0 %3326, %v2459_v12   ;;  %v2549_v28 = vrot.slane %v2541_v13, %v3666_v40  ;;  %v2001_v29 = vrot.slane %v3714_v6, %v3655_v33  ;;  %v2005_v34 = vrot.slane %v3714_v6, %v3658_v37 }
  0xd6   :  { %v2556_v35 = vrot.slane %v2542_v19, %v3666_v40  ;;  %3377 = vpow2.f32 %v3319_v21  ;;  %v2009_v36 = vrot.slane %v3714_v6, %v3663_v1  ;;  %v2558_v41 = vcombine.low %v1981_v7, %v1985_v11 }
  0xd7   :  { %3379 = vrcp.f32 %v294_v25  ;;  %v2559_v42 = vcombine.low %v1989_v17, %v1993_v22  ;;  %v2560_v44 = vcombine.low %v1997_v23, %v2001_v29  ;;  %v2013_v45 = vrot.slane %v3722_v59, %v3640_v26 }
  0xd8   :  { %v2557_v46 = vcombine.low %v2549_v28, %v2556_v35  ;;  %v2561_v47 = vcombine.low %v2005_v34, %v2009_v36  ;;  %v2568_v48 = vrot.slane %v2558_v41, %v3666_v40  ;;  %v2017_v49 = vrot.slane %v3722_v59, %v3643_v27 }
  0xd9   :  { %v3801_v50 = vpop.eup %3373  ;;  %v2575_v51 = vrot.slane %v2559_v42, %v3666_v40  ;;  %v2582_v52 = vrot.slane %v2560_v44, %v3666_v40  ;;  %v2021_v53 = vrot.slane %v3722_v59, %v3646_v30  ;;  %v2025_v55 = vrot.slane %v3722_v59, %v3649_v31 }
  0xda   :  { %3156 = vperm.xlu0 %3326, %v2557_v46   ;;  %v2589_v58 = vrot.slane %v2561_v47, %v3666_v40  ;;  %v2029_v60 = vrot.slane %v3722_v59, %v3652_v32  ;;  %v2033_v61 = vrot.slane %v3722_v59, %v3655_v33  ;;  %v2037_v62 = vrot.slane %v3722_v59, %v3658_v37  ;;  %v112_v46 = vpop.xlane.xlu0 %111 }
  0xdb   :  { %v2590_v63 = vcombine.low %v2568_v48, %v2575_v51  ;;  %v2041_v2 = vrot.slane %v3722_v59, %v3663_v1  ;;  %v2607_v3 = vcombine.low %v2013_v45, %v2017_v49  ;;  %v2608_v5 = vcombine.low %v2021_v53, %v2025_v55  ;;  %v199_v45 = vpop.xlane.xlu1 %198 }
  0xdc   :  { %v2591_v7 = vcombine.low %v2582_v52, %v2589_v58  ;;  %v2609_v8 = vcombine.low %v2029_v60, %v2033_v61  ;;  %v214_v9 = vadd.f32 %v196_v56, %v109_v57  ;;  %v2045_v10 = vrot.slane %v3741_v14, %v3640_v26 }
  0xdd   :  { %v3820_v11 = vpop.eup %3375  ;;  %v2598_v12 = vrot.slane %v2590_v63, %v3666_v40  ;;  %v2610_v13 = vcombine.low %v2037_v62, %v2041_v2  ;;  %v2617_v17 = vrot.slane %v2607_v3, %v3666_v40  ;;  %v2624_v18 = vrot.slane %v2608_v5, %v3666_v40 }
  0xde   :  { %v2605_v19 = vrot.slane %v2591_v7, %v3666_v40  ;;  %v2631_v21 = vrot.slane %v2609_v8, %v3666_v40  ;;  %v232_v22 = vadd.f32 %v3626_v39, %v214_v9  ;;  %v2049_v23 = vrot.slane %v3741_v14, %v3643_v27 }
  0xdf   :  { %v2638_v25 = vrot.slane %v2610_v13, %v3666_v40  ;;  %v2639_v28 = vcombine.low %v2617_v17, %v2624_v18  ;;  %v2053_v29 = vrot.slane %v3741_v14, %v3646_v30  ;;  %v2057_v34 = vrot.slane %v3741_v14, %v3649_v31 }
  0xe0   :  { %v3378_v35 = vpop.eup %3377  ;;  %v2606_v36 = vcombine.low %v2598_v12, %v2605_v19  ;;  %v3320_v41 = vmul.f32 -1.442695, %v232_v22  ;;  %v2061_v42 = vrot.slane %v3741_v14, %v3652_v32  ;;  %v2065_v44 = vrot.slane %v3741_v14, %v3655_v33 }
  0xe1   :  { %v3839_v47 = vpop.eup %3379  ;;  %v295_v48 = vadd.f32 1.0, %v3378_v35  ;;  %v2640_v49 = vcombine.low %v2631_v21, %v2638_v25  ;;  %v2647_v51 = vrot.slane %v2639_v28, %v3666_v40  ;;  %v2069_v52 = vrot.slane %v3741_v14, %v3658_v37 }
  0xe2   :  { %3159 = vperm.xlu1 %3325, %v2606_v36   ;;  %3381 = vpow2.f32 %v3320_v41  ;;  %v2073_v53 = vrot.slane %v3741_v14, %v3663_v1  ;;  %v2656_v55 = vcombine.low %v2045_v10, %v2049_v23  ;;  %v2657_v56 = vcombine.low %v2053_v29, %v2057_v34 }
  0xe3   :  { %3383 = vrcp.f32 %v295_v48  ;;  %v2654_v57 = vrot.slane %v2640_v49, %v3666_v40  ;;  %v2658_v58 = vcombine.low %v2061_v42, %v2065_v44  ;;  %v215_v60 = vadd.f32 %v199_v45, %v112_v46 }
  0xe4   :  { %v2659_v61 = vcombine.low %v2069_v52, %v2073_v53  ;;  %v2666_v62 = vrot.slane %v2656_v55, %v3666_v40  ;;  %v2673_v63 = vrot.slane %v2657_v56, %v3666_v40  ;;  %v2077_v2 = vrot.slane %v3756_v43, %v3640_v26 }
  0xe5   :  { %v2655_v3 = vcombine.low %v2647_v51, %v2654_v57  ;;  %v2680_v5 = vrot.slane %v2658_v58, %v3666_v40  ;;  %v233_v7 = vadd.f32 %v3626_v39, %v215_v60  ;;  %v2081_v8 = vrot.slane %v3756_v43, %v3643_v27 }
  0xe6   :  { %v2687_v9 = vrot.slane %v2659_v61, %v3666_v40  ;;  %v2688_v10 = vcombine.low %v2666_v62, %v2673_v63  ;;  %v2085_v12 = vrot.slane %v3756_v43, %v3646_v30  ;;  %v2089_v13 = vrot.slane %v3756_v43, %v3649_v31 }
  0xe7   :  { %3162 = vperm.xlu0 %3326, %v2655_v3   ;;  %v3321_v17 = vmul.f32 -1.442695, %v233_v7  ;;  %v2093_v18 = vrot.slane %v3756_v43, %v3652_v32  ;;  %v2097_v39 = vrot.slane %v3756_v43, %v3655_v33  ;;  %v2101_v19 = vrot.slane %v3756_v43, %v3658_v37 }
  0xe8   :  { %v2689_v21 = vcombine.low %v2680_v5, %v2687_v9  ;;  %v2696_v22 = vrot.slane %v2688_v10, %v3666_v40  ;;  %v2105_v23 = vrot.slane %v3756_v43, %v3663_v1  ;;  %v2705_v25 = vcombine.low %v2077_v2, %v2081_v8 }
  0xe9   :  { %3385 = vpow2.f32 %v3321_v17  ;;  %v2706_v28 = vcombine.low %v2085_v12, %v2089_v13  ;;  %v2707_v29 = vcombine.low %v2093_v18, %v2097_v39  ;;  %v2109_v34 = vrot.slane %v3769_v0, %v3640_v26 }
  0xea   :  { %v2703_v35 = vrot.slane %v2689_v21, %v3666_v40  ;;  %v2708_v36 = vcombine.low %v2101_v19, %v2105_v23  ;;  %v2715_v41 = vrot.slane %v2705_v25, %v3666_v40  ;;  %v2113_v42 = vrot.slane %v3769_v0, %v3643_v27 }
  0xeb   :  { %v2722_v44 = vrot.slane %v2706_v28, %v3666_v40  ;;  %v2729_v45 = vrot.slane %v2707_v29, %v3666_v40  ;;  %v2117_v46 = vrot.slane %v3769_v0, %v3646_v30  ;;  %v2121_v48 = vrot.slane %v3769_v0, %v3649_v31 }
  0xec   :  { %v3382_v49 = vpop.eup %3381  ;;  %v2704_v51 = vcombine.low %v2696_v22, %v2703_v35  ;;  %v2736_v52 = vrot.slane %v2708_v36, %v3666_v40  ;;  %v2125_v53 = vrot.slane %v3769_v0, %v3652_v32  ;;  %v2129_v55 = vrot.slane %v3769_v0, %v3655_v33 }
  0xed   :  { %v3886_v56 = vpop.eup %3383  ;;  %v296_v57 = vadd.f32 1.0, %v3382_v49  ;;  %v2737_v58 = vcombine.low %v2715_v41, %v2722_v44  ;;  %v2133_v60 = vrot.slane %v3769_v0, %v3658_v37  ;;  %v2137_v61 = vrot.slane %v3769_v0, %v3663_v1 }
  0xee   :  { %3165 = vperm.xlu1 %3325, %v2704_v51   ;;  %v2738_v62 = vcombine.low %v2729_v45, %v2736_v52  ;;  %v2754_v63 = vcombine.low %v2109_v34, %v2113_v42  ;;  %v2755_v2 = vcombine.low %v2117_v46, %v2121_v48  ;;  %v2756_v3 = vcombine.low %v2125_v53, %v2129_v55 }
  0xef   :  { %3387 = vrcp.f32 %v296_v57  ;;  %v2745_v5 = vrot.slane %v2737_v58, %v3666_v40  ;;  %v2757_v7 = vcombine.low %v2133_v60, %v2137_v61  ;;  %v333_v8 = vsub.f32 1.0, %v3698_v15 }
  0xf0   :  { %v2752_v9 = vrot.slane %v2738_v62, %v3666_v40  ;;  %v2764_v10 = vrot.slane %v2754_v63, %v3666_v40  ;;  %v2771_v12 = vrot.slane %v2755_v2, %v3666_v40  ;;  %v2778_v13 = vrot.slane %v2756_v3, %v3666_v40 }
  0xf1   :  { %v2785_v17 = vrot.slane %v2757_v7, %v3666_v40  ;;  %v399_v18 = vrot.slane %v333_v8, %v3640_v26  ;;  %v403_v39 = vrot.slane %v333_v8, %v3643_v27  ;;  %v407_v19 = vrot.slane %v333_v8, %v3646_v30 }
  0xf2   :  { %v2753_v21 = vcombine.low %v2745_v5, %v2752_v9  ;;  %v2786_v22 = vcombine.low %v2764_v10, %v2771_v12  ;;  %v411_v15 = vrot.slane %v333_v8, %v3649_v31  ;;  %v415_v23 = vrot.slane %v333_v8, %v3652_v32 }
  0xf3   :  { %v3386_v25 = vpop.eup %3385  ;;  %v2787_v28 = vcombine.low %v2778_v13, %v2785_v17  ;;  %v419_v29 = vrot.slane %v333_v8, %v3655_v33  ;;  %v423_v34 = vrot.slane %v333_v8, %v3658_v37  ;;  %v427_v35 = vrot.slane %v333_v8, %v3663_v1 }
  0xf4   :  { %v297_v36 = vadd.f32 1.0, %v3386_v25  ;;  %3168 = vperm.xlu0 %3326, %v2753_v21   ;;  %v2794_v41 = vrot.slane %v2786_v22, %v3666_v40  ;;  %v925_v42 = vcombine.low %v399_v18, %v403_v39  ;;  %v926_v44 = vcombine.low %v407_v19, %v411_v15 }
  0xf5   :  { %v2801_v45 = vrot.slane %v2787_v28, %v3666_v40  ;;  %v927_v46 = vcombine.low %v415_v23, %v419_v29  ;;  %v928_v48 = vcombine.low %v423_v34, %v427_v35  ;;  %v2141_v49 = vrot.slane %v3786_v24, %v3640_v26 }
  0xf6   :  { %3389 = vrcp.f32 %v297_v36  ;;  %v935_v51 = vrot.slane %v925_v42, %v3666_v40  ;;  %v942_v52 = vrot.slane %v926_v44, %v3666_v40  ;;  %v2145_v53 = vrot.slane %v3786_v24, %v3643_v27 }
  0xf7   :  { %v2802_v55 = vcombine.low %v2794_v41, %v2801_v45  ;;  %v949_v57 = vrot.slane %v927_v46, %v3666_v40  ;;  %v956_v58 = vrot.slane %v928_v48, %v3666_v40  ;;  %v2149_v60 = vrot.slane %v3786_v24, %v3646_v30 }
  0xf8   :  { %v957_v61 = vcombine.low %v935_v51, %v942_v52  ;;  %v2153_v62 = vrot.slane %v3786_v24, %v3649_v31  ;;  %v2157_v63 = vrot.slane %v3786_v24, %v3652_v32  ;;  %v2161_v2 = vrot.slane %v3786_v24, %v3655_v33 }
  0xf9   :  { %v3925_v3 = vpop.eup %3387  ;;  %3171 = vperm.xlu1 %3325, %v2802_v55   ;;  %v958_v5 = vcombine.low %v949_v57, %v956_v58  ;;  %v2165_v7 = vrot.slane %v3786_v24, %v3658_v37  ;;  %v2169_v8 = vrot.slane %v3786_v24, %v3663_v1  ;;  %v2803_v9 = vcombine.low %v2141_v49, %v2145_v53 }
  0xfa   :  { %v965_v10 = vrot.slane %v957_v61, %v3666_v40  ;;  %v2804_v12 = vcombine.low %v2149_v60, %v2153_v62  ;;  %v2805_v13 = vcombine.low %v2157_v63, %v2161_v2  ;;  %v334_v17 = vsub.f32 1.0, %v3683_v54 }
  0xfb   :  { %v972_v18 = vrot.slane %v958_v5, %v3666_v40  ;;  %v2806_v39 = vcombine.low %v2165_v7, %v2169_v8  ;;  %v2813_v19 = vrot.slane %v2803_v9, %v3666_v40  ;;  %v2173_v21 = vrot.slane %v3801_v50, %v3640_v26 }
  0xfc   :  { %v2820_v22 = vrot.slane %v2804_v12, %v3666_v40  ;;  %v2827_v15 = vrot.slane %v2805_v13, %v3666_v40  ;;  %v431_v23 = vrot.slane %v334_v17, %v3640_v26  ;;  %v435_v25 = vrot.slane %v334_v17, %v3643_v27 }
  0xfd   :  { %v973_v28 = vcombine.low %v965_v10, %v972_v18  ;;  %v2834_v29 = vrot.slane %v2806_v39, %v3666_v40  ;;  %v439_v54 = vrot.slane %v334_v17, %v3646_v30  ;;  %v443_v34 = vrot.slane %v334_v17, %v3649_v31 }
  0xfe   :  { %v2835_v35 = vcombine.low %v2813_v19, %v2820_v22  ;;  %v447_v36 = vrot.slane %v334_v17, %v3652_v32  ;;  %v451_v41 = vrot.slane %v334_v17, %v3655_v33  ;;  %v455_v42 = vrot.slane %v334_v17, %v3658_v37 }
  0xff   :  { %1664 = vperm.xlu1 %3325, %v973_v28   ;;  %v2836_v44 = vcombine.low %v2827_v15, %v2834_v29  ;;  %v459_v45 = vrot.slane %v334_v17, %v3663_v1  ;;  %v974_v46 = vcombine.low %v431_v23, %v435_v25  ;;  %v975_v48 = vcombine.low %v439_v54, %v443_v34 }
 0x100   :  { %v3948_v49 = vpop.eup %3389  ;;  %v2843_v51 = vrot.slane %v2835_v35, %v3666_v40  ;;  %v976_v52 = vcombine.low %v447_v36, %v451_v41  ;;  %v2177_v53 = vrot.slane %v3801_v50, %v3643_v27  ;;  %v2181_v55 = vrot.slane %v3801_v50, %v3646_v30 }
 0x101   :  { %v2850_v57 = vrot.slane %v2836_v44, %v3666_v40  ;;  %v977_v58 = vcombine.low %v455_v42, %v459_v45  ;;  %v984_v60 = vrot.slane %v974_v46, %v3666_v40  ;;  %v991_v61 = vrot.slane %v975_v48, %v3666_v40 }
 0x102   :  { %v998_v62 = vrot.slane %v976_v52, %v3666_v40  ;;  %v2185_v63 = vrot.slane %v3801_v50, %v3649_v31  ;;  %v2189_v2 = vrot.slane %v3801_v50, %v3652_v32  ;;  %v2193_v5 = vrot.slane %v3801_v50, %v3655_v33 }
 0x103   :  { %v2851_v7 = vcombine.low %v2843_v51, %v2850_v57  ;;  %v1005_v8 = vrot.slane %v977_v58, %v3666_v40  ;;  %v1006_v9 = vcombine.low %v984_v60, %v991_v61  ;;  %v2197_v10 = vrot.slane %v3801_v50, %v3658_v37 }
 0x104   :  { %v2201_v12 = vrot.slane %v3801_v50, %v3663_v1  ;;  %v2852_v13 = vcombine.low %v2173_v21, %v2177_v53  ;;  %v2853_v17 = vcombine.low %v2181_v55, %v2185_v63  ;;  %v2854_v18 = vcombine.low %v2189_v2, %v2193_v5 }
 0x105   :  { %3174 = vperm.xlu0 %3326, %v2851_v7   ;;  %v1007_v39 = vcombine.low %v998_v62, %v1005_v8  ;;  %v1014_v19 = vrot.slane %v1006_v9, %v3666_v40  ;;  %v335_v22 = vsub.f32 1.0, %v3705_v20  ;;  %v2205_v15 = vrot.slane %v3820_v11, %v3640_v26 }
 0x106   :  { %v2855_v23 = vcombine.low %v2197_v10, %v2201_v12  ;;  %v2862_v25 = vrot.slane %v2852_v13, %v3666_v40  ;;  %v2869_v28 = vrot.slane %v2853_v17, %v3666_v40  ;;  %v2876_v29 = vrot.slane %v2854_v18, %v3666_v40 }
 0x107   :  { %v1021_v21 = vrot.slane %v1007_v39, %v3666_v40  ;;  %v463_v54 = vrot.slane %v335_v22, %v3640_v26  ;;  %v467_v34 = vrot.slane %v335_v22, %v3643_v27  ;;  %v471_v35 = vrot.slane %v335_v22, %v3646_v30 }
 0x108   :  { %v2883_v20 = vrot.slane %v2855_v23, %v3666_v40  ;;  %v2884_v36 = vcombine.low %v2862_v25, %v2869_v28  ;;  %v475_v41 = vrot.slane %v335_v22, %v3649_v31  ;;  %v479_v42 = vrot.slane %v335_v22, %v3652_v32 }
 0x109   :  { %v1022_v44 = vcombine.low %v1014_v19, %v1021_v21  ;;  %v483_v45 = vrot.slane %v335_v22, %v3655_v33  ;;  %v487_v46 = vrot.slane %v335_v22, %v3658_v37  ;;  %v491_v48 = vrot.slane %v335_v22, %v3663_v1 }
 0x10a   :  { %v2885_v51 = vcombine.low %v2876_v29, %v2883_v20  ;;  %v2892_v52 = vrot.slane %v2884_v36, %v3666_v40  ;;  %v1023_v53 = vcombine.low %v463_v54, %v467_v34  ;;  %v1024_v55 = vcombine.low %v471_v35, %v475_v41 }
 0x10b   :  { %1667 = vperm.xlu1 %3325, %v1022_v44   ;;  %v1025_v57 = vcombine.low %v479_v42, %v483_v45  ;;  %v1026_v58 = vcombine.low %v487_v46, %v491_v48  ;;  %v2209_v60 = vrot.slane %v3820_v11, %v3643_v27  ;;  %v2213_v61 = vrot.slane %v3820_v11, %v3646_v30 }
 0x10c   :  { %v2899_v62 = vrot.slane %v2885_v51, %v3666_v40  ;;  %v1033_v63 = vrot.slane %v1023_v53, %v3666_v40  ;;  %v1040_v2 = vrot.slane %v1024_v55, %v3666_v40  ;;  %v2217_v5 = vrot.slane %v3820_v11, %v3649_v31 }
 0x10d   :  { %v1047_v7 = vrot.slane %v1025_v57, %v3666_v40  ;;  %v1054_v8 = vrot.slane %v1026_v58, %v3666_v40  ;;  %v2221_v9 = vrot.slane %v3820_v11, %v3652_v32  ;;  %v2225_v10 = vrot.slane %v3820_v11, %v3655_v33 }
 0x10e   :  { %v2900_v12 = vcombine.low %v2892_v52, %v2899_v62  ;;  %v1055_v13 = vcombine.low %v1033_v63, %v1040_v2  ;;  %v2229_v17 = vrot.slane %v3820_v11, %v3658_v37  ;;  %v2233_v18 = vrot.slane %v3820_v11, %v3663_v1 }
 0x10f   :  { %v1056_v39 = vcombine.low %v1047_v7, %v1054_v8  ;;  %v2901_v19 = vcombine.low %v2205_v15, %v2209_v60  ;;  %v2902_v22 = vcombine.low %v2213_v61, %v2217_v5  ;;  %v2903_v23 = vcombine.low %v2221_v9, %v2225_v10 }
 0x110   :  { %3177 = vperm.xlu0 %3326, %v2900_v12   ;;  %v1063_v25 = vrot.slane %v1055_v13, %v3666_v40  ;;  %v2904_v28 = vcombine.low %v2229_v17, %v2233_v18  ;;  %v336_v29 = vsub.f32 1.0, %v3714_v6  ;;  %v2237_v21 = vrot.slane %v3839_v47, %v3640_v26 }
 0x111   :  { %v1070_v54 = vrot.slane %v1056_v39, %v3666_v40  ;;  %v2911_v34 = vrot.slane %v2901_v19, %v3666_v40  ;;  %v2918_v35 = vrot.slane %v2902_v22, %v3666_v40  ;;  %v2925_v20 = vrot.slane %v2903_v23, %v3666_v40 }
 0x112   :  { %v2932_v15 = vrot.slane %v2904_v28, %v3666_v40  ;;  %v495_v36 = vrot.slane %v336_v29, %v3640_v26  ;;  %v499_v41 = vrot.slane %v336_v29, %v3643_v27  ;;  %v503_v42 = vrot.slane %v336_v29, %v3646_v30 }
 0x113   :  { %v1071_v6 = vcombine.low %v1063_v25, %v1070_v54  ;;  %v2933_v44 = vcombine.low %v2911_v34, %v2918_v35  ;;  %v507_v45 = vrot.slane %v336_v29, %v3649_v31  ;;  %v511_v46 = vrot.slane %v336_v29, %v3652_v32 }
 0x114   :  { %v2934_v48 = vcombine.low %v2925_v20, %v2932_v15  ;;  %v515_v51 = vrot.slane %v336_v29, %v3655_v33  ;;  %v519_v52 = vrot.slane %v336_v29, %v3658_v37  ;;  %v523_v53 = vrot.slane %v336_v29, %v3663_v1 }
 0x115   :  { %1670 = vperm.xlu1 %3325, %v1071_v6   ;;  %v2941_v55 = vrot.slane %v2933_v44, %v3666_v40  ;;  %v1072_v57 = vcombine.low %v495_v36, %v499_v41  ;;  %v1073_v58 = vcombine.low %v503_v42, %v507_v45  ;;  %v2241_v60 = vrot.slane %v3839_v47, %v3643_v27 }
 0x116   :  { %v2948_v61 = vrot.slane %v2934_v48, %v3666_v40  ;;  %v1074_v62 = vcombine.low %v511_v46, %v515_v51  ;;  %v1075_v63 = vcombine.low %v519_v52, %v523_v53  ;;  %v2245_v2 = vrot.slane %v3839_v47, %v3646_v30 }
 0x117   :  { %v1082_v5 = vrot.slane %v1072_v57, %v3666_v40  ;;  %v1089_v7 = vrot.slane %v1073_v58, %v3666_v40  ;;  %v2249_v8 = vrot.slane %v3839_v47, %v3649_v31  ;;  %v2253_v9 = vrot.slane %v3839_v47, %v3652_v32 }
 0x118   :  { %v2949_v10 = vcombine.low %v2941_v55, %v2948_v61  ;;  %v1096_v12 = vrot.slane %v1074_v62, %v3666_v40  ;;  %v1103_v13 = vrot.slane %v1075_v63, %v3666_v40  ;;  %v2257_v17 = vrot.slane %v3839_v47, %v3655_v33 }
 0x119   :  { %v1104_v18 = vcombine.low %v1082_v5, %v1089_v7  ;;  %v2261_v39 = vrot.slane %v3839_v47, %v3658_v37  ;;  %v2265_v19 = vrot.slane %v3839_v47, %v3663_v1  ;;  %v2950_v22 = vcombine.low %v2237_v21, %v2241_v60 }
 0x11a   :  { %3180 = vperm.xlu0 %3326, %v2949_v10   ;;  %v1105_v23 = vcombine.low %v1096_v12, %v1103_v13  ;;  %v2951_v25 = vcombine.low %v2245_v2, %v2249_v8  ;;  %v2952_v28 = vcombine.low %v2253_v9, %v2257_v17  ;;  %v337_v29 = vsub.f32 1.0, %v3722_v59 }
 0x11b   :  { %v1112_v54 = vrot.slane %v1104_v18, %v3666_v40  ;;  %v2953_v34 = vcombine.low %v2261_v39, %v2265_v19  ;;  %v2960_v35 = vrot.slane %v2950_v22, %v3666_v40  ;;  %v332_v20 = vsub.f32 1.0, %v3660_v38 }
 0x11c   :  { %v1119_v15 = vrot.slane %v1105_v23, %v3666_v40  ;;  %v2967_v36 = vrot.slane %v2951_v25, %v3666_v40  ;;  %v2974_v41 = vrot.slane %v2952_v28, %v3666_v40  ;;  %v527_v21 = vrot.slane %v337_v29, %v3640_v26 }
 0x11d   :  { %v2981_v42 = vrot.slane %v2953_v34, %v3666_v40  ;;  %v531_v6 = vrot.slane %v337_v29, %v3643_v27  ;;  %v535_v59 = vrot.slane %v337_v29, %v3646_v30  ;;  %v539_v44 = vrot.slane %v337_v29, %v3649_v31 }
 0x11e   :  { %v1120_v45 = vcombine.low %v1112_v54, %v1119_v15  ;;  %v2982_v46 = vcombine.low %v2960_v35, %v2967_v36  ;;  %v543_v38 = vrot.slane %v337_v29, %v3652_v32  ;;  %v547_v48 = vrot.slane %v337_v29, %v3655_v33 }
 0x11f   :  { %v2983_v51 = vcombine.low %v2974_v41, %v2981_v42  ;;  %v551_v52 = vrot.slane %v337_v29, %v3658_v37  ;;  %v555_v53 = vrot.slane %v337_v29, %v3663_v1  ;;  %v1121_v55 = vcombine.low %v527_v21, %v531_v6 }
 0x120   :  { %1673 = vperm.xlu1 %3325, %v1120_v45   ;;  %v2990_v57 = vrot.slane %v2982_v46, %v3666_v40  ;;  %v1122_v58 = vcombine.low %v535_v59, %v539_v44  ;;  %v1123_v60 = vcombine.low %v543_v38, %v547_v48  ;;  %v367_v61 = vrot.slane %v332_v20, %v3640_v26 }
 0x121   :  { %v2997_v62 = vrot.slane %v2983_v51, %v3666_v40  ;;  %v1124_v63 = vcombine.low %v551_v52, %v555_v53  ;;  %v1131_v2 = vrot.slane %v1121_v55, %v3666_v40  ;;  %v371_v5 = vrot.slane %v332_v20, %v3643_v27 }
 0x122   :  { %v1138_v7 = vrot.slane %v1122_v58, %v3666_v40  ;;  %v1145_v8 = vrot.slane %v1123_v60, %v3666_v40  ;;  %v375_v9 = vrot.slane %v332_v20, %v3646_v30  ;;  %v379_v10 = vrot.slane %v332_v20, %v3649_v31 }
 0x123   :  { %v2998_v12 = vcombine.low %v2990_v57, %v2997_v62  ;;  %v1152_v13 = vrot.slane %v1124_v63, %v3666_v40  ;;  %v383_v17 = vrot.slane %v332_v20, %v3652_v32  ;;  %v387_v18 = vrot.slane %v332_v20, %v3655_v33 }
 0x124   :  { %v1153_v39 = vcombine.low %v1131_v2, %v1138_v7  ;;  %v391_v19 = vrot.slane %v332_v20, %v3658_v37  ;;  %v395_v22 = vrot.slane %v332_v20, %v3663_v1  ;;  %v876_v23 = vcombine.low %v367_v61, %v371_v5 }
 0x125   :  { %3183 = vperm.xlu0 %3326, %v2998_v12   ;;  %v1154_v25 = vcombine.low %v1145_v8, %v1152_v13  ;;  %v877_v28 = vcombine.low %v375_v9, %v379_v10  ;;  %v878_v29 = vcombine.low %v383_v17, %v387_v18  ;;  %v338_v54 = vsub.f32 1.0, %v3741_v14 }
 0x126   :  { %v1161_v34 = vrot.slane %v1153_v39, %v3666_v40  ;;  %v879_v35 = vcombine.low %v391_v19, %v395_v22  ;;  %v886_v15 = vrot.slane %v876_v23, %v3666_v40  ;;  %v2269_v36 = vrot.slane %v3886_v56, %v3640_v26 }
 0x127   :  { %v1168_v41 = vrot.slane %v1154_v25, %v3666_v40  ;;  %v893_v21 = vrot.slane %v877_v28, %v3666_v40  ;;  %v900_v20 = vrot.slane %v878_v29, %v3666_v40  ;;  %v559_v42 = vrot.slane %v338_v54, %v3640_v26 }
 0x128   :  { %v907_v6 = vrot.slane %v879_v35, %v3666_v40  ;;  %v563_v14 = vrot.slane %v338_v54, %v3643_v27  ;;  %v567_v59 = vrot.slane %v338_v54, %v3646_v30  ;;  %v571_v44 = vrot.slane %v338_v54, %v3649_v31 }
 0x129   :  { %v1169_v45 = vcombine.low %v1161_v34, %v1168_v41  ;;  %v908_v46 = vcombine.low %v886_v15, %v893_v21  ;;  %v575_v38 = vrot.slane %v338_v54, %v3652_v32  ;;  %v579_v48 = vrot.slane %v338_v54, %v3655_v33 }
 0x12a   :  { %v909_v51 = vcombine.low %v900_v20, %v907_v6  ;;  %v583_v52 = vrot.slane %v338_v54, %v3658_v37  ;;  %v587_v53 = vrot.slane %v338_v54, %v3663_v1  ;;  %v1170_v55 = vcombine.low %v559_v42, %v563_v14 }
 0x12b   :  { %1676 = vperm.xlu1 %3325, %v1169_v45   ;;  %v916_v57 = vrot.slane %v908_v46, %v3666_v40  ;;  %v1171_v58 = vcombine.low %v567_v59, %v571_v44  ;;  %v1172_v60 = vcombine.low %v575_v38, %v579_v48  ;;  %v2273_v61 = vrot.slane %v3886_v56, %v3643_v27 }
 0x12c   :  { %v923_v62 = vrot.slane %v909_v51, %v3666_v40  ;;  %v1173_v63 = vcombine.low %v583_v52, %v587_v53  ;;  %v1180_v2 = vrot.slane %v1170_v55, %v3666_v40  ;;  %v2277_v5 = vrot.slane %v3886_v56, %v3646_v30 }
 0x12d   :  { %v1187_v7 = vrot.slane %v1171_v58, %v3666_v40  ;;  %v1194_v8 = vrot.slane %v1172_v60, %v3666_v40  ;;  %v2281_v9 = vrot.slane %v3886_v56, %v3649_v31  ;;  %v2285_v10 = vrot.slane %v3886_v56, %v3652_v32 }
 0x12e   :  { %v924_v12 = vcombine.low %v916_v57, %v923_v62  ;;  %v1201_v13 = vrot.slane %v1173_v63, %v3666_v40  ;;  %v2289_v17 = vrot.slane %v3886_v56, %v3655_v33  ;;  %v2293_v18 = vrot.slane %v3886_v56, %v3658_v37 }
 0x12f   :  { %v1202_v39 = vcombine.low %v1180_v2, %v1187_v7  ;;  %v2297_v19 = vrot.slane %v3886_v56, %v3663_v1  ;;  %v2999_v22 = vcombine.low %v2269_v36, %v2273_v61  ;;  %v3000_v23 = vcombine.low %v2277_v5, %v2281_v9 }
 0x130   :  { %1661 = vperm.xlu0 %3326, %v924_v12   ;;  %v1203_v25 = vcombine.low %v1194_v8, %v1201_v13  ;;  %v3001_v28 = vcombine.low %v2285_v10, %v2289_v17  ;;  %v339_v29 = vsub.f32 1.0, %v3756_v43  ;;  %v341_v54 = vsub.f32 1.0, %v3786_v24 }
 0x131   :  { %v1210_v34 = vrot.slane %v1202_v39, %v3666_v40  ;;  %v3002_v35 = vcombine.low %v2293_v18, %v2297_v19  ;;  %v3009_v15 = vrot.slane %v2999_v22, %v3666_v40  ;;  %v3016_v41 = vrot.slane %v3000_v23, %v3666_v40 }
 0x132   :  { %v1217_v21 = vrot.slane %v1203_v25, %v3666_v40  ;;  %v3023_v20 = vrot.slane %v3001_v28, %v3666_v40  ;;  %v591_v36 = vrot.slane %v339_v29, %v3640_v26  ;;  %v595_v42 = vrot.slane %v339_v29, %v3643_v27 }
 0x133   :  { %v3030_v6 = vrot.slane %v3002_v35, %v3666_v40  ;;  %v3031_v43 = vcombine.low %v3009_v15, %v3016_v41  ;;  %v599_v24 = vrot.slane %v339_v29, %v3646_v30  ;;  %v603_v14 = vrot.slane %v339_v29, %v3649_v31 }
 0x134   :  { %v1218_v59 = vcombine.low %v1210_v34, %v1217_v21  ;;  %v607_v44 = vrot.slane %v339_v29, %v3652_v32  ;;  %v611_v45 = vrot.slane %v339_v29, %v3655_v33  ;;  %v615_v46 = vrot.slane %v339_v29, %v3658_v37 }
 0x135   :  { %v3032_v38 = vcombine.low %v3023_v20, %v3030_v6  ;;  %v3039_v48 = vrot.slane %v3031_v43, %v3666_v40  ;;  %v619_v51 = vrot.slane %v339_v29, %v3663_v1  ;;  %v1219_v52 = vcombine.low %v591_v36, %v595_v42 }
 0x136   :  { %1679 = vperm.xlu1 %3325, %v1218_v59   ;;  %v1220_v53 = vcombine.low %v599_v24, %v603_v14  ;;  %v1221_v55 = vcombine.low %v607_v44, %v611_v45  ;;  %v655_v57 = vrot.slane %v341_v54, %v3640_v26  ;;  %v659_v58 = vrot.slane %v341_v54, %v3643_v27 }
 0x137   :  { %v3046_v60 = vrot.slane %v3032_v38, %v3666_v40  ;;  %v1222_v61 = vcombine.low %v615_v46, %v619_v51  ;;  %v1229_v62 = vrot.slane %v1219_v52, %v3666_v40  ;;  %v663_v63 = vrot.slane %v341_v54, %v3646_v30 }
 0x138   :  { %v1236_v2 = vrot.slane %v1220_v53, %v3666_v40  ;;  %v1243_v5 = vrot.slane %v1221_v55, %v3666_v40  ;;  %v667_v7 = vrot.slane %v341_v54, %v3649_v31  ;;  %v671_v8 = vrot.slane %v341_v54, %v3652_v32 }
 0x139   :  { %v3047_v9 = vcombine.low %v3039_v48, %v3046_v60  ;;  %v1250_v10 = vrot.slane %v1222_v61, %v3666_v40  ;;  %v675_v12 = vrot.slane %v341_v54, %v3655_v33  ;;  %v679_v13 = vrot.slane %v341_v54, %v3658_v37 }
 0x13a   :  { %v1251_v17 = vcombine.low %v1229_v62, %v1236_v2  ;;  %v683_v18 = vrot.slane %v341_v54, %v3663_v1  ;;  %v1317_v39 = vcombine.low %v655_v57, %v659_v58  ;;  %v1318_v19 = vcombine.low %v663_v63, %v667_v7 }
 0x13b   :  { %3186 = vperm.xlu0 %3326, %v3047_v9   ;;  %v1252_v22 = vcombine.low %v1243_v5, %v1250_v10  ;;  %v1319_v23 = vcombine.low %v671_v8, %v675_v12  ;;  %v340_v25 = vsub.f32 1.0, %v3769_v0  ;;  %v2301_v28 = vrot.slane %v3925_v3, %v3640_v26 }
 0x13c   :  { %v1259_v29 = vrot.slane %v1251_v17, %v3666_v40  ;;  %v1320_v34 = vcombine.low %v679_v13, %v683_v18  ;;  %v1327_v35 = vrot.slane %v1317_v39, %v3666_v40  ;;  %v1334_v15 = vrot.slane %v1318_v19, %v3666_v40 }
 0x13d   :  { %v1266_v41 = vrot.slane %v1252_v22, %v3666_v40  ;;  %v1341_v54 = vrot.slane %v1319_v23, %v3666_v40  ;;  %v623_v21 = vrot.slane %v340_v25, %v3640_v26  ;;  %v627_v20 = vrot.slane %v340_v25, %v3643_v27 }
 0x13e   :  { %v1348_v0 = vrot.slane %v1320_v34, %v3666_v40  ;;  %v1349_v36 = vcombine.low %v1327_v35, %v1334_v15  ;;  %v631_v42 = vrot.slane %v340_v25, %v3646_v30  ;;  %v635_v6 = vrot.slane %v340_v25, %v3649_v31 }
 0x13f   :  { %v1267_v43 = vcombine.low %v1259_v29, %v1266_v41  ;;  %v639_v24 = vrot.slane %v340_v25, %v3652_v32  ;;  %v643_v14 = vrot.slane %v340_v25, %v3655_v33  ;;  %v647_v59 = vrot.slane %v340_v25, %v3658_v37 }
 0x140   :  { %v1350_v44 = vcombine.low %v1341_v54, %v1348_v0  ;;  %v1357_v45 = vrot.slane %v1349_v36, %v3666_v40  ;;  %v651_v46 = vrot.slane %v340_v25, %v3663_v1  ;;  %v1268_v38 = vcombine.low %v623_v21, %v627_v20 }
 0x141   :  { %1682 = vperm.xlu1 %3325, %v1267_v43   ;;  %v1269_v48 = vcombine.low %v631_v42, %v635_v6  ;;  %v1270_v51 = vcombine.low %v639_v24, %v643_v14  ;;  %v2305_v52 = vrot.slane %v3925_v3, %v3643_v27  ;;  %v2309_v53 = vrot.slane %v3925_v3, %v3646_v30 }
 0x142   :  { %v1364_v55 = vrot.slane %v1350_v44, %v3666_v40  ;;  %v1271_v57 = vcombine.low %v647_v59, %v651_v46  ;;  %v1278_v58 = vrot.slane %v1268_v38, %v3666_v40  ;;  %v2313_v60 = vrot.slane %v3925_v3, %v3649_v31 }
 0x143   :  { %v1285_v61 = vrot.slane %v1269_v48, %v3666_v40  ;;  %v1292_v62 = vrot.slane %v1270_v51, %v3666_v40  ;;  %v2317_v63 = vrot.slane %v3925_v3, %v3652_v32  ;;  %v2321_v2 = vrot.slane %v3925_v3, %v3655_v33 }
 0x144   :  { %v1365_v5 = vcombine.low %v1357_v45, %v1364_v55  ;;  %v1299_v7 = vrot.slane %v1271_v57, %v3666_v40  ;;  %v2325_v8 = vrot.slane %v3925_v3, %v3658_v37  ;;  %v2329_v9 = vrot.slane %v3925_v3, %v3663_v1 }
 0x145   :  { %v1300_v10 = vcombine.low %v1278_v58, %v1285_v61  ;;  %v3048_v12 = vcombine.low %v2301_v28, %v2305_v52  ;;  %v3049_v13 = vcombine.low %v2309_v53, %v2313_v60  ;;  %v3050_v17 = vcombine.low %v2317_v63, %v2321_v2 }
 0x146   :  { %1688 = vperm.xlu0 %3326, %v1365_v5   ;;  %v1301_v18 = vcombine.low %v1292_v62, %v1299_v7  ;;  %v3051_v39 = vcombine.low %v2325_v8, %v2329_v9  ;;  %v342_v19 = vsub.f32 1.0, %v3801_v50  ;;  %v2333_v22 = vrot.slane %v3948_v49, %v3640_v26 }
 0x147   :  { %v1308_v23 = vrot.slane %v1300_v10, %v3666_v40  ;;  %v3058_v25 = vrot.slane %v3048_v12, %v3666_v40  ;;  %v3065_v29 = vrot.slane %v3049_v13, %v3666_v40  ;;  %v3072_v34 = vrot.slane %v3050_v17, %v3666_v40 }
 0x148   :  { %v1315_v28 = vrot.slane %v1301_v18, %v3666_v40  ;;  %v3079_v35 = vrot.slane %v3051_v39, %v3666_v40  ;;  %v687_v15 = vrot.slane %v342_v19, %v3640_v26  ;;  %v691_v41 = vrot.slane %v342_v19, %v3643_v27 }
 0x149   :  { %v3080_v50 = vcombine.low %v3058_v25, %v3065_v29  ;;  %v695_v54 = vrot.slane %v342_v19, %v3646_v30  ;;  %v699_v21 = vrot.slane %v342_v19, %v3649_v31  ;;  %v703_v20 = vrot.slane %v342_v19, %v3652_v32 }
 0x14a   :  { %v1316_v0 = vcombine.low %v1308_v23, %v1315_v28  ;;  %v3081_v36 = vcombine.low %v3072_v34, %v3079_v35  ;;  %v707_v42 = vrot.slane %v342_v19, %v3655_v33  ;;  %v711_v6 = vrot.slane %v342_v19, %v3658_v37 }
 0x14b   :  { %v3088_v43 = vrot.slane %v3080_v50, %v3666_v40  ;;  %v715_v24 = vrot.slane %v342_v19, %v3663_v1  ;;  %v1366_v14 = vcombine.low %v687_v15, %v691_v41  ;;  %v1367_v59 = vcombine.low %v695_v54, %v699_v21 }
 0x14c   :  { %1685 = vperm.xlu1 %3325, %v1316_v0   ;;  %v3095_v44 = vrot.slane %v3081_v36, %v3666_v40  ;;  %v1368_v45 = vcombine.low %v703_v20, %v707_v42  ;;  %v2337_v46 = vrot.slane %v3948_v49, %v3643_v27  ;;  %v2341_v38 = vrot.slane %v3948_v49, %v3646_v30 }
 0x14d   :  { %v1369_v48 = vcombine.low %v711_v6, %v715_v24  ;;  %v1376_v51 = vrot.slane %v1366_v14, %v3666_v40  ;;  %v1383_v52 = vrot.slane %v1367_v59, %v3666_v40  ;;  %v2345_v53 = vrot.slane %v3948_v49, %v3649_v31 }
 0x14e   :  { %v3096_v55 = vcombine.low %v3088_v43, %v3095_v44  ;;  %v1390_v57 = vrot.slane %v1368_v45, %v3666_v40  ;;  %v2349_v58 = vrot.slane %v3948_v49, %v3652_v32  ;;  %v2353_v60 = vrot.slane %v3948_v49, %v3655_v33 }
 0x14f   :  { %v1397_v61 = vrot.slane %v1369_v48, %v3666_v40  ;;  %v1398_v62 = vcombine.low %v1376_v51, %v1383_v52  ;;  %v2357_v63 = vrot.slane %v3948_v49, %v3658_v37  ;;  %v2361_v2 = vrot.slane %v3948_v49, %v3663_v1 }
 0x150   :  { %3189 = vperm.xlu0 %3326, %v3096_v55   ;;  %v3097_v5 = vcombine.low %v2333_v22, %v2337_v46  ;;  %v3098_v7 = vcombine.low %v2341_v38, %v2345_v53  ;;  %v3099_v8 = vcombine.low %v2349_v58, %v2353_v60  ;;  %v343_v9 = vsub.f32 1.0, %v3820_v11 }
 0x151   :  { %v1399_v10 = vcombine.low %v1390_v57, %v1397_v61  ;;  %v1406_v12 = vrot.slane %v1398_v62, %v3666_v40  ;;  %v3100_v13 = vcombine.low %v2357_v63, %v2361_v2  ;;  %v344_v17 = vsub.f32 1.0, %v3839_v47 }
 0x152   :  { %v3107_v18 = vrot.slane %v3097_v5, %v3666_v40  ;;  %v3114_v39 = vrot.slane %v3098_v7, %v3666_v40  ;;  %v3121_v19 = vrot.slane %v3099_v8, %v3666_v40  ;;  %v719_v23 = vrot.slane %v343_v9, %v3640_v26 }
 0x153   :  { %v1413_v22 = vrot.slane %v1399_v10, %v3666_v40  ;;  %v3128_v25 = vrot.slane %v3100_v13, %v3666_v40  ;;  %v723_v11 = vrot.slane %v343_v9, %v3643_v27  ;;  %v727_v29 = vrot.slane %v343_v9, %v3646_v30 }
 0x154   :  { %v3129_v34 = vcombine.low %v3107_v18, %v3114_v39  ;;  %v731_v28 = vrot.slane %v343_v9, %v3649_v31  ;;  %v735_v47 = vrot.slane %v343_v9, %v3652_v32  ;;  %v739_v35 = vrot.slane %v343_v9, %v3655_v33 }
 0x155   :  { %v1414_v15 = vcombine.low %v1406_v12, %v1413_v22  ;;  %v3130_v41 = vcombine.low %v3121_v19, %v3128_v25  ;;  %v743_v50 = vrot.slane %v343_v9, %v3658_v37  ;;  %v747_v54 = vrot.slane %v343_v9, %v3663_v1 }
 0x156   :  { %v3137_v21 = vrot.slane %v3129_v34, %v3666_v40  ;;  %v1415_v20 = vcombine.low %v719_v23, %v723_v11  ;;  %v1416_v0 = vcombine.low %v727_v29, %v731_v28  ;;  %v1417_v36 = vcombine.low %v735_v47, %v739_v35 }
 0x157   :  { %1691 = vperm.xlu1 %3325, %v1414_v15   ;;  %v3144_v42 = vrot.slane %v3130_v41, %v3666_v40  ;;  %v1418_v6 = vcombine.low %v743_v50, %v747_v54  ;;  %v751_v43 = vrot.slane %v344_v17, %v3640_v26  ;;  %v755_v24 = vrot.slane %v344_v17, %v3643_v27 }
 0x158   :  { %v1425_v14 = vrot.slane %v1415_v20, %v3666_v40  ;;  %v1432_v59 = vrot.slane %v1416_v0, %v3666_v40  ;;  %v1439_v44 = vrot.slane %v1417_v36, %v3666_v40  ;;  %v759_v45 = vrot.slane %v344_v17, %v3646_v30 }
 0x159   :  { %v3145_v46 = vcombine.low %v3137_v21, %v3144_v42  ;;  %v1446_v38 = vrot.slane %v1418_v6, %v3666_v40  ;;  %v763_v48 = vrot.slane %v344_v17, %v3649_v31  ;;  %v767_v51 = vrot.slane %v344_v17, %v3652_v32 }
 0x15a   :  { %v1447_v52 = vcombine.low %v1425_v14, %v1432_v59  ;;  %v771_v53 = vrot.slane %v344_v17, %v3655_v33  ;;  %v775_v55 = vrot.slane %v344_v17, %v3658_v37  ;;  %v779_v57 = vrot.slane %v344_v17, %v3663_v1 }
 0x15b   :  { %3192 = vperm.xlu0 %3326, %v3145_v46   ;;  %v1448_v58 = vcombine.low %v1439_v44, %v1446_v38  ;;  %v1464_v60 = vcombine.low %v751_v43, %v755_v24  ;;  %v1465_v61 = vcombine.low %v759_v45, %v763_v48  ;;  %v345_v62 = vsub.f32 1.0, %v3886_v56 }
 0x15c   :  { %v1455_v63 = vrot.slane %v1447_v52, %v3666_v40  ;;  %v1466_v2 = vcombine.low %v767_v51, %v771_v53  ;;  %v1467_v5 = vcombine.low %v775_v55, %v779_v57  ;;  %v346_v7 = vsub.f32 1.0, %v3925_v3 }
 0x15d   :  { %v1462_v8 = vrot.slane %v1448_v58, %v3666_v40  ;;  %v1474_v9 = vrot.slane %v1464_v60, %v3666_v40  ;;  %v1481_v10 = vrot.slane %v1465_v61, %v3666_v40  ;;  %v783_v12 = vrot.slane %v345_v62, %v3640_v26 }
 0x15e   :  { %v1488_v13 = vrot.slane %v1466_v2, %v3666_v40  ;;  %v1495_v17 = vrot.slane %v1467_v5, %v3666_v40  ;;  %v787_v56 = vrot.slane %v345_v62, %v3643_v27  ;;  %v791_v18 = vrot.slane %v345_v62, %v3646_v30 }
 0x15f   :  { %v1463_v39 = vcombine.low %v1455_v63, %v1462_v8  ;;  %v1496_v19 = vcombine.low %v1474_v9, %v1481_v10  ;;  %v795_v3 = vrot.slane %v345_v62, %v3649_v31  ;;  %v799_v23 = vrot.slane %v345_v62, %v3652_v32 }
 0x160   :  { %v1497_v22 = vcombine.low %v1488_v13, %v1495_v17  ;;  %v803_v25 = vrot.slane %v345_v62, %v3655_v33  ;;  %v807_v11 = vrot.slane %v345_v62, %v3658_v37  ;;  %v811_v29 = vrot.slane %v345_v62, %v3663_v1 }
 0x161   :  { %1694 = vperm.xlu1 %3325, %v1463_v39   ;;  %v1504_v34 = vrot.slane %v1496_v19, %v3666_v40  ;;  %v1513_v28 = vcombine.low %v783_v12, %v787_v56  ;;  %v1514_v47 = vcombine.low %v791_v18, %v795_v3  ;;  %v815_v35 = vrot.slane %v346_v7, %v3640_v26 }
 0x162   :  { %v1511_v15 = vrot.slane %v1497_v22, %v3666_v40  ;;  %v1515_v41 = vcombine.low %v799_v23, %v803_v25  ;;  %v1516_v50 = vcombine.low %v807_v11, %v811_v29  ;;  %v819_v54 = vrot.slane %v346_v7, %v3643_v27  ;;  %v3148_v11 = vpop.permute.xlu1 %3147 }
 0x163   :  { %v1523_v21 = vrot.slane %v1513_v28, %v3666_v40  ;;  %v1530_v20 = vrot.slane %v1514_v47, %v3666_v40  ;;  %v823_v0 = vrot.slane %v346_v7, %v3646_v30  ;;  %v827_v36 = vrot.slane %v346_v7, %v3649_v31 }
 0x164   :  { %v1512_v42 = vcombine.low %v1504_v34, %v1511_v15  ;;  %v1537_v6 = vrot.slane %v1515_v41, %v3666_v40  ;;  %v1544_v43 = vrot.slane %v1516_v50, %v3666_v40  ;;  %v831_v24 = vrot.slane %v346_v7, %v3652_v32  ;;  %v3151_v15 = vpop.permute.xlu0 %3150 }
 0x165   :  { %v1545_v14 = vcombine.low %v1523_v21, %v1530_v20  ;;  %v835_v59 = vrot.slane %v346_v7, %v3655_v33  ;;  %v839_v44 = vrot.slane %v346_v7, %v3658_v37  ;;  %v843_v45 = vrot.slane %v346_v7, %v3663_v1 }
 0x166   :  { %1697 = vperm.xlu1 %3325, %v1512_v42   ;;  %v1546_v46 = vcombine.low %v1537_v6, %v1544_v43  ;;  %v1562_v38 = vcombine.low %v815_v35, %v819_v54  ;;  %v1563_v48 = vcombine.low %v823_v0, %v827_v36  ;;  %v347_v51 = vsub.f32 1.0, %v3948_v49  ;;  %v3154_v29 = vpop.permute.xlu1 %3153 }
 0x167   :  { %v1553_v52 = vrot.slane %v1545_v14, %v3666_v40  ;;  %v1564_v53 = vcombine.low %v831_v24, %v835_v59  ;;  %v1565_v55 = vcombine.low %v839_v44, %v843_v45  ;;  %v4325_v44 = vand.u32 127, %v364_v4 }
 0x168   :  { %v1560_v57 = vrot.slane %v1546_v46, %v3666_v40  ;;  %v1572_v58 = vrot.slane %v1562_v38, %v3666_v40  ;;  %v1579_v60 = vrot.slane %v1563_v48, %v3666_v40  ;;  %v847_v61 = vrot.slane %v347_v51, %v3640_v26  ;;  %v3157_v50 = vpop.permute.xlu0 %3156 }
 0x169   :  { %v1586_v62 = vrot.slane %v1564_v53, %v3666_v40  ;;  %v1593_v63 = vrot.slane %v1565_v55, %v3666_v40  ;;  %v851_v2 = vrot.slane %v347_v51, %v3643_v27  ;;  %v855_v49 = vrot.slane %v347_v51, %v3646_v30 }
 0x16a   :  { %v1561_v5 = vcombine.low %v1553_v52, %v1560_v57  ;;  %v1594_v7 = vcombine.low %v1572_v58, %v1579_v60  ;;  %v859_v8 = vrot.slane %v347_v51, %v3649_v31  ;;  %v863_v9 = vrot.slane %v347_v51, %v3652_v32  ;;  %v4298_v34 = vpop.permute.xlu1 %3159 }
 0x16b   :  { %v1595_v10 = vcombine.low %v1586_v62, %v1593_v63  ;;  %v867_v12 = vrot.slane %v347_v51, %v3655_v33  ;;  %v871_v13 = vrot.slane %v347_v51, %v3658_v37  ;;  %v875_v26 = vrot.slane %v347_v51, %v3663_v1 }
 0x16c   :  { %1700 = vperm.xlu1 %3325, %v1561_v5   ;;  %v1602_v17 = vrot.slane %v1594_v7, %v3666_v40  ;;  %v1611_v56 = vcombine.low %v847_v61, %v851_v2  ;;  %v1612_v27 = vcombine.low %v855_v49, %v859_v8  ;;  %v4304_v54 = vpop.permute.xlu0 %3162  ;;  %v1714_v45 = vadd.s32 4294967288, %v4325_v44 }
 0x16d   :  { %v1609_v30 = vrot.slane %v1595_v10, %v3666_v40  ;;  %v1613_v18 = vcombine.low %v863_v9, %v867_v12  ;;  %v1614_v39 = vcombine.low %v871_v13, %v875_v26  ;;  %v1721_v48 = vadd.s32 4294967280, %v4325_v44 }
 0x16e   :  { %v1621_v31 = vrot.slane %v1611_v56, %v3666_v40  ;;  %v1628_v32 = vrot.slane %v1612_v27, %v3666_v40  ;;  %v4300_v28 = vpop.permute.xlu1 %3165  ;;  %v1717_v51 = vsub.s32 %v1714_v45, %v3636_v16  ;;  %v1728_v52 = vadd.s32 4294967272, %v4325_v44 }
 0x16f   :  { %v1610_v19 = vcombine.low %v1602_v17, %v1609_v30  ;;  %v1635_v33 = vrot.slane %v1613_v18, %v3666_v40  ;;  %v1642_v37 = vrot.slane %v1614_v39, %v3666_v40  ;;  %v1712_v53 = vsub.s32 %v4325_v44, %v3636_v16 }
 0x170   :  { %v1643_v3 = vcombine.low %v1621_v31, %v1628_v32  ;;  %v1735_v55 = vadd.s32 4294967264, %v4325_v44  ;;  %v1724_v4 = vsub.s32 %v1721_v48, %v3636_v16  ;;  %v1742_v58 = vadd.s32 4294967256, %v4325_v44 }
 0x171   :  { %1703 = vperm.xlu1 %3325, %v1610_v19   ;;  %v1644_v1 = vcombine.low %v1635_v33, %v1642_v37  ;;  %v3201_v61 = vrot.slane %v3151_v15, %v1717_v51  ;;  %v1731_v62 = vsub.s32 %v1728_v52, %v3636_v16  ;;  %v1749_v63 = vadd.s32 4294967248, %v4325_v44 }
 0x172   :  { %v1651_v23 = vrot.slane %v1643_v3, %v3666_v40  ;;  %v3197_v5 = vrot.slane %v3148_v11, %v1712_v53  ;;  %v1738_v7 = vsub.s32 %v1735_v55, %v3636_v16  ;;  %v3206_v8 = vrot.slane %v3154_v29, %v1724_v4 }
 0x173   :  { %v1658_v22 = vrot.slane %v1644_v1, %v3666_v40  ;;  %v4306_v20 = vpop.permute.xlu0 %3168  ;;  %v1745_v9 = vsub.s32 %v1742_v58, %v3636_v16  ;;  %v3211_v13 = vrot.slane %v3157_v50, %v1731_v62  ;;  %v4347_v26 = vsub.s32 %v1749_v63, %v3636_v16 }
 0x174   :  { %v3202_v12 = vsel %vm1719_vm1, %v3201_v61, %v3197_v5  ;;  %v1756_v27 = vadd.s32 4294967240, %v4325_v44  ;;  %v3216_v30 = vrot.slane %v4298_v34, %v1738_v7  ;;  %v1763_v18 = vadd.s32 4294967232, %v4325_v44 }
 0x175   :  { %v1659_v25 = vcombine.low %v1651_v23, %v1658_v22  ;;  %v3207_v32 = vsel %vm1726_vm2, %v3206_v8, %v3202_v12  ;;  %v3221_v19 = vrot.slane %v4304_v54, %v1745_v9  ;;  %v1770_v33 = vadd.s32 4294967224, %v4325_v44 }
 0x176   :  { %v3212_v3 = vsel %vm1733_vm3, %v3211_v13, %v3207_v32  ;;  %v3226_v1 = vrot.slane %v4300_v28, %v4347_v26  ;;  %v1777_v23 = vadd.s32 4294967216, %v4325_v44  ;;  %v1759_v22 = vsub.s32 %v1756_v27, %v3636_v16 }
 0x177   :  { %1706 = vperm.xlu1 %3325, %v1659_v25   ;;  %v1784_v25 = vadd.s32 4294967208, %v4325_v44  ;;  %v3217_v34 = vsel %vm1740_vm4, %v3216_v30, %v3212_v3  ;;  %v1791_v28 = vadd.s32 4294967200, %v4325_v44  ;;  %v1773_v50 = vsub.s32 %v1770_v33, %v3636_v16 }
 0x178   :  { %v4302_v47 = vpop.permute.xlu1 %3171  ;;  %v1798_v54 = vadd.s32 4294967192, %v4325_v44  ;;  %v1780_v45 = vsub.s32 %v1777_v23, %v3636_v16  ;;  %v1805_v48 = vadd.s32 4294967184, %v4325_v44  ;;  %v1812_v55 = vadd.s32 4294967176, %v4325_v44 }
 0x179   :  { %v1787_v52 = vsub.s32 %v1784_v25, %v3636_v16  ;;  %v1794_v58 = vsub.s32 %v1791_v28, %v3636_v16 }
 0x17a   :  { %v1808_v44 = vsub.s32 %v1805_v48, %v3636_v16 }
 0x17e   :  { %v1665_v35 = vpop.permute.xlu1 %1664 }
 0x17f   :  { %v1718_v49 = vrot.slane %v1665_v35, %v1717_v51  ;;  %v1766_v35 = vsub.s32 %v1763_v18, %v3636_v16 }
 0x184   :  { %v4310_v36 = vpop.permute.xlu0 %3174 }
 0x185   :  { %v3241_v61 = vrot.slane %v4310_v36, %v1773_v50  ;;  %v1815_v36 = vsub.s32 %v1812_v55, %v3636_v16 }
 0x18a   :  { %v1668_v41 = vpop.permute.xlu1 %1667 }
 0x18b   :  { %v1725_v17 = vrot.slane %v1668_v41, %v1724_v4  ;;  %v3222_v41 = vsel %vm1747_vm5, %v3221_v19, %v3217_v34  ;;  %v3236_v4 = vrot.slane %v4302_v47, %v1766_v35 }
 0x18f   :  { %v4314_v6 = vpop.permute.xlu0 %3177 }
 0x194   :  { %v1671_v21 = vpop.permute.xlu1 %1670 }
 0x195   :  { %v1732_v37 = vrot.slane %v1671_v21, %v1731_v62  ;;  %v3227_v21 = vsel %vm1754_vm6, %v3226_v1, %v3222_v41 }
 0x199   :  { %v4318_v24 = vpop.permute.xlu0 %3180 }
 0x19f   :  { %v4308_v0 = vpop.permute.xlu1 %1673 }
 0x1a0   :  { %v1739_v15 = vrot.slane %v4308_v0, %v1738_v7  ;;  %v3231_v0 = vrot.slane %v4306_v20, %v1759_v22  ;;  %v1801_v20 = vsub.s32 %v1798_v54, %v3636_v16 }
 0x1a2   :  { %v3232_v5 = vsel %vm1761_vm7, %v3231_v0, %v3227_v21 }
 0x1a3   :  { %v3237_v7 = vsel %vm1768_vm8, %v3236_v4, %v3232_v5 }
 0x1a4   :  { %v4322_v59 = vpop.permute.xlu0 %3183 }
 0x1a5   :  { %v3256_v8 = vrot.slane %v4322_v59, %v1794_v58 }
 0x1aa   :  { %v4312_v42 = vpop.permute.xlu1 %1676 }
 0x1af   :  { %v1662_v38 = vpop.permute.xlu0 %1661 }
 0x1b0   :  { %v1713_v60 = vrot.slane %v1662_v38, %v1712_v53  ;;  %v1746_v53 = vrot.slane %v4312_v42, %v1745_v9  ;;  %v3246_v42 = vrot.slane %v4314_v6, %v1780_v45  ;;  %v3242_v9 = vsel %vm1775_vm9, %v3241_v61, %v3237_v7 }
 0x1b2   :  { %v1720_v10 = vsel %vm1719_vm1, %v1718_v49, %v1713_v60 }
 0x1b3   :  { %v1727_v39 = vsel %vm1726_vm2, %v1725_v17, %v1720_v10 }
 0x1b4   :  { %v1734_v11 = vsel %vm1733_vm3, %v1732_v37, %v1727_v39 }
 0x1b5   :  { %v4316_v43 = vpop.permute.xlu1 %1679  ;;  %v1741_v38 = vsel %vm1740_vm4, %v1739_v15, %v1734_v11 }
 0x1b6   :  { %v1753_v60 = vrot.slane %v4316_v43, %v4347_v26  ;;  %v1748_v62 = vsel %vm1747_vm5, %v1746_v53, %v1741_v38  ;;  %v3251_v43 = vrot.slane %v4318_v24, %v1787_v52  ;;  %v3247_v24 = vsel %vm1782_vm10, %v3246_v42, %v3242_v9 }
 0x1b8   :  { %v3252_v59 = vsel %vm1789_vm11, %v3251_v43, %v3247_v24 }
 0x1ba   :  { %v4342_v2 = vpop.permute.xlu0 %3186 }
 0x1c0   :  { %v4320_v14 = vpop.permute.xlu1 %1682 }
 0x1c1   :  { %v1760_v63 = vrot.slane %v4320_v14, %v1759_v22  ;;  %v1755_v14 = vsel %vm1754_vm6, %v1753_v60, %v1748_v62 }
 0x1c3   :  { %v1762_v10 = vsel %vm1761_vm7, %v1760_v63, %v1755_v14 }
 0x1c5   :  { %v4355_v31 = vpop.permute.xlu0 %1688 }
 0x1c6   :  { %v1774_v17 = vrot.slane %v4355_v31, %v1773_v50 }
 0x1cb   :  { %v4328_v46 = vpop.permute.xlu1 %1685 }
 0x1cc   :  { %v1767_v47 = vrot.slane %v4328_v46, %v1766_v35  ;;  %v3261_v46 = vrot.slane %v4342_v2, %v1801_v20  ;;  %v3257_v2 = vsel %vm1796_vm12, %v3256_v8, %v3252_v59 }
 0x1ce   :  { %v1769_v12 = vsel %vm1768_vm8, %v1767_v47, %v1762_v10  ;;  %v3262_v39 = vsel %vm1803_vm13, %v3261_v46, %v3257_v2 }
 0x1cf   :  { %v3190_v51 = vpop.permute.xlu0 %3189  ;;  %v1776_v32 = vsel %vm1775_vm9, %v1774_v17, %v1769_v12 }
 0x1d0   :  { %v3266_v16 = vrot.slane %v3190_v51, %v1808_v44 }
 0x1d6   :  { %v4336_v57 = vpop.permute.xlu1 %1691 }
 0x1d7   :  { %v1781_v13 = vrot.slane %v4336_v57, %v1780_v45  ;;  %v3267_v57 = vsel %vm1810_vm14, %v3266_v16, %v3262_v39 }
 0x1d9   :  { %v1783_v33 = vsel %vm1782_vm10, %v1781_v13, %v1776_v32 }
 0x1da   :  { %v3193_v6 = vpop.permute.xlu0 %3192 }
 0x1db   :  { %v3271_v27 = vrot.slane %v3193_v6, %v1815_v36 }
 0x1dd   :  { %v3272_v31 = vsel %vm1817_vm15, %v3271_v27, %v3267_v57 }
 0x1de   :  { %v3279_v25 = vrot.slane %v3272_v31, %v3666_v40 }
 0x1e0   :  { %v4349_v56 = vpop.permute.xlu1 %1694  ;;  %v3286_v28 = vrot.slane %v3279_v25, %v3666_v40 }
 0x1e1   :  { %v1788_v30 = vrot.slane %v4349_v56, %v1787_v52 }
 0x1e3   :  { %v1790_v3 = vsel %vm1789_vm11, %v1788_v30, %v1783_v33 }
 0x1e5   :  { %v4367_v29 = vpop.permute.xlu1 %1697 }
 0x1e6   :  { %v1795_v18 = vrot.slane %v4367_v29, %v1794_v58  ;;  %v330_v29 = vld [vmem:[%s4446_s5] sm:$0x1] }
 0x1e7   :  { %vm331_vm0 = vcmp.ne.s32.totalorder %v330_v29, 0 }
 0x1e8   :  { %v1797_v56 = vsel %vm1796_vm12, %v1795_v18, %v1790_v3 }
 0x1eb   :  { %v1701_v49 = vpop.permute.xlu1 %1700 }
 0x1ec   :  { %v1802_v19 = vrot.slane %v1701_v49, %v1801_v20 }
 0x1ee   :  { %v1804_v23 = vsel %vm1803_vm13, %v1802_v19, %v1797_v56 }
 0x1f0   :  { %v1704_v26 = vpop.permute.xlu1 %1703 }
 0x1f1   :  { %v1809_v37 = vrot.slane %v1704_v26, %v1808_v44 }
 0x1f3   :  { %v1811_v11 = vsel %vm1810_vm14, %v1809_v37, %v1804_v23 }
 0x1f6   :  { %v1707_v1 = vpop.permute.xlu1 %1706 }
 0x1f7   :  { %v1816_v22 = vrot.slane %v1707_v1, %v1815_v36 }
 0x1f9   :  { %v1818_v34 = vsel %vm1817_vm15, %v1816_v22, %v1811_v11 }
 0x1fa   :  { %v1825_v35 = vrot.slane %v1818_v34, %v3666_v40 }
 0x1fc   :  { %v1832_v15 = vrot.slane %v1825_v35, %v3666_v40 }
 0x1fe   :  { %v3288_v41 = vsel %vm331_vm0, %v1832_v15, %v3286_v28 }
 0x1ff   :  { %3289 = vst [vmem:[#allocation3] sm:$0x1] %v3288_v41 }
 0x200   :  { %3402 = shalt.err (!%p3399_p4)
}
 0x201   :  { %s3403_s17 = scalar_lea.hbm %s4447_s6, 16 }
 0x202   :  { %p3404_p5 = scmp.ne.s32.totalorder %s4447_s6, %s3403_s17  ;;  %p3407_p6 = scmp.lt.u32.totalorder %s3403_s17, %s4447_s6 }
 0x204   :  { %p3409_p7 = pnand %p3407_p6, %p3404_p5 }
 0x206   :  { %3412 = shalt.err (!%p3409_p7)
}
 0x207   :  { %3299 = dma.vmem_to_hbm [thread:$0]  %s3297_s13, 16, %s4447_s6, [#allocation4]  }
 0x208   :  { %3413 = dma.done.wait [#allocation4], 16  }
 0x209   :  { %3414 = vsyncadd [#allocation4], 4294967280 }
 0x20a   :  { %3303 = vsyncpa [#allocation4], 1 }

</bundles_post_ra>
